<compile_context>
chip_gen: v7x
topology: tpu7x:2x2x1
jax: 0.10.0
libtpu: 0.0.40
codegen_flags: <defaults>
</compile_context>

<pallas_src>
import math

import jax
import jax.numpy as jnp
from jax import lax
from jax.experimental import pallas as pl
from jax.experimental.pallas import tpu as pltpu

EPS = 1e-6


# ----------------------------- kernel-side math -----------------------------

def _layernorm(x, g, b):
    mu = jnp.mean(x, axis=-1, keepdims=True)
    var = jnp.mean((x - mu) ** 2, axis=-1, keepdims=True)
    return (x - mu) * lax.rsqrt(var + EPS) * g + b


def _gelu_exact(x):
    # torch.nn.GELU() default = exact erf formulation
    return 0.5 * x * (1.0 + lax.erf(x * (1.0 / math.sqrt(2.0))))


def make_fused_encoder_kernel(B, S, D, num_heads):
    hd = D // num_heads
    scale = 1.0 / math.sqrt(hd)
    BS = B * S
    bf16 = jnp.bfloat16

    def kernel(x_ref, pos_ref,
               ln1g, ln1b, wqkv, bqkv, wo, bo,
               ln2g, ln2b, w1, b1, w2, b2,
               lnfg, lnfb,
               o_ref,
               act_ref, ctx_ref):
        layer = pl.program_id(0)
        last = pl.num_programs(0) - 1

        # Layer 0: positional-embedding add, broadcast over B in-kernel.
        # (dropout is identity in eval mode)
        @pl.when(layer == 0)
        def _():
            x3 = x_ref[...].reshape(B, S, D)
            act_ref[...] = (x3 + pos_ref[...][None, :, :]).reshape(BS, D)

        x = act_ref[...]                               # (B*S, D) running act, f32

        # ---------------- self-attention branch ----------------
        h = _layernorm(x, ln1g[0], ln1b[0])            # f32
        qkv = jnp.dot(h.astype(bf16), wqkv[0],         # bf16 x bf16 -> f32 acc
                      preferred_element_type=jnp.float32) + bqkv[0]
        qkv3 = qkv.reshape(B, S, 3 * D)                # (B, S, 3D), f32

        # Per-head attention batched over B; heads are a static unrolled loop
        # (see NOTE above).  Each head writes its context into the
        # head-contiguous ctx scratch; ONE fused out-projection follows.
        for hi in range(num_heads):
            lo = hi * hd
            q_h = (qkv3[:, :, lo:lo + hd] * scale).astype(bf16)        # (B,S,hd)
            k_h = qkv3[:, :, D + lo:D + lo + hd].astype(bf16)
            v_h = qkv3[:, :, 2 * D + lo:2 * D + lo + hd].astype(bf16)
            s = jnp.einsum("bqd,bkd->bqk", q_h, k_h,
                           preferred_element_type=jnp.float32)         # (B,S,S) f32
            s = s - jnp.max(s, axis=-1, keepdims=True)
            p = jnp.exp(s)
            p = p * pl.reciprocal(jnp.sum(p, axis=-1, keepdims=True), approx=True)
            o_h = jnp.einsum("bqk,bkd->bqd", p.astype(bf16), v_h,
                             preferred_element_type=jnp.float32)       # (B,S,hd)
            ctx_ref[:, lo:lo + hd] = o_h.reshape(BS, hd)

        attn = jnp.dot(ctx_ref[...].astype(bf16), wo[0],               # one (BS,D)@(D,D)
                       preferred_element_type=jnp.float32) + bo[0]
        x1 = x + attn                                   # residual 1 (f32)

        # ---------------- MLP branch ----------------
        h2 = _layernorm(x1, ln2g[0], ln2b[0])
        m = jnp.dot(h2.astype(bf16), w1[0], preferred_element_type=jnp.float32) + b1[0]
        m = _gelu_exact(m)
        m = jnp.dot(m.astype(bf16), w2[0], preferred_element_type=jnp.float32) + b2[0]
        y = x1 + m                                      # residual 2 (f32)

        act_ref[...] = y                                # carry to next layer

        @pl.when(layer == last)
        def _():
            o_ref[...] = _layernorm(y, lnfg[...], lnfb[...]).astype(o_ref.dtype)

    return kernel


# ------------------------------ pallas wrapper ------------------------------

_LAYER_PARAM_KEYS = ("ln1g", "ln1b", "wqkv", "bqkv", "wo", "bo",
                     "ln2g", "ln2b", "w1", "b1", "w2", "b2")
_BF16_WEIGHT_KEYS = ("wqkv", "wo", "w1", "w2")   # stored bf16 in HBM (matmul operands)


def encoder_forward(x, params, num_heads):
    B, S, D = x.shape
    L = params["wqkv"].shape[0]
    F = params["w1"].shape[2]
    BS = B * S

    x2 = x.reshape(BS, D)                       # batch-flattened activations
    pos2 = params["pos"][0]                     # (S, D): broadcast over B in-kernel

    layer_args = [
        params[k].astype(jnp.bfloat16) if k in _BF16_WEIGHT_KEYS else params[k]
        for k in _LAYER_PARAM_KEYS
    ]

    def full_spec(a):
        return pl.BlockSpec(a.shape, lambda l, _n=a.ndim: (0,) * _n)

    def layer_spec(a):                           # stacked (L, ...) weights
        return pl.BlockSpec((1,) + a.shape[1:],
                            lambda l, _n=a.ndim: (l,) + (0,) * (_n - 1))

    in_specs = ([full_spec(x2), full_spec(pos2)]
                + [layer_spec(a) for a in layer_args]
                + [full_spec(params["ln_g"]), full_spec(params["ln_b"])])

    # VMEM plan: resident f32 activations/scratch (~a few * BS*D*4B) plus the
    # double-buffered bf16 per-layer matmul weights.  Clamp so we never request
    # less than the v5e/v6e scoped defaults nor more than fits v7x's 64 MiB.
    bf16_layer_bytes = 2 * (D * 3 * D + D * D + D * F + F * D)
    vmem_est = 6 * BS * D * 4 + 2 * bf16_layer_bytes + (2 << 20)
    vmem_limit = int(min(max(vmem_est, 32 * 1024 * 1024), 60 * 1024 * 1024))

    out2 = pl.pallas_call(
        make_fused_encoder_kernel(B, S, D, num_heads),
        out_shape=jax.ShapeDtypeStruct((BS, D), x.dtype),
        grid=(L,),
        in_specs=in_specs,
        out_specs=pl.BlockSpec((BS, D), lambda l: (0, 0)),
        scratch_shapes=[pltpu.VMEM((BS, D), jnp.float32),   # running activation
                        pltpu.VMEM((BS, D), jnp.float32)],  # per-layer attn context
        compiler_params=pltpu.CompilerParams(
            dimension_semantics=("arbitrary",),
            vmem_limit_bytes=vmem_limit),
    )(x2, pos2, *layer_args, params["ln_g"], params["ln_b"])
    return out2.reshape(B, S, D)


# ----------------------------- pure-JAX reference -----------------------------

def _ln_ref(x, g, b):
    mu = x.mean(-1, keepdims=True)
    var = ((x - mu) ** 2).mean(-1, keepdims=True)
    return (x - mu) / jnp.sqrt(var + EPS) * g + b


def encoder_ref(x, params, num_heads):
    B, S, D = x.shape
    hd = D // num_heads
    L = params["wqkv"].shape[0]
    x = x + params["pos"]
    for l in range(L):
        h = _ln_ref(x, params["ln1g"][l, 0], params["ln1b"][l, 0])
        qkv = h @ params["wqkv"][l] + params["bqkv"][l, 0]
        q, k, v = jnp.split(qkv, 3, axis=-1)
        q = q.reshape(B, S, num_heads, hd).transpose(0, 2, 1, 3)
        k = k.reshape(B, S, num_heads, hd).transpose(0, 2, 1, 3)
        v = v.reshape(B, S, num_heads, hd).transpose(0, 2, 1, 3)
        s = jnp.einsum("bhqd,bhkd->bhqk", q, k) / math.sqrt(hd)
        a = jax.nn.softmax(s, axis=-1)
        o = jnp.einsum("bhqk,bhkd->bhqd", a, v).transpose(0, 2, 1, 3).reshape(B, S, D)
        o = o @ params["wo"][l] + params["bo"][l, 0]
        x = x + o
        h2 = _ln_ref(x, params["ln2g"][l, 0], params["ln2b"][l, 0])
        m = h2 @ params["w1"][l] + params["b1"][l, 0]
        m = 0.5 * m * (1.0 + lax.erf(m / math.sqrt(2.0)))
        m = m @ params["w2"][l] + params["b2"][l, 0]
        x = x + m
    return _ln_ref(x, params["ln_g"], params["ln_b"])


# --------------------------------- params init ---------------------------------

def init_params(key, seq_len, num_layers, dim, ff_dim):
    # Weights stored as (in_features, out_features); PyTorch in_proj_weight /
    # Linear.weight layouts must be transposed when exporting real checkpoints.
    def nrm(k, shape, scale=0.02):
        return (scale * jax.random.normal(k, shape)).astype(jnp.float32)

    ks = jax.random.split(key, 9)
    return {
        "pos":  nrm(ks[0], (1, seq_len, dim)),
        "ln_g": jnp.ones((1, dim), jnp.float32),
        "ln_b": jnp.zeros((1, dim), jnp.float32),
        "ln1g": jnp.ones((num_layers, 1, dim), jnp.float32),
        "ln1b": jnp.zeros((num_layers, 1, dim), jnp.float32),
        "wqkv": nrm(ks[1], (num_layers, dim, 3 * dim)),
        "bqkv": nrm(ks[2], (num_layers, 1, 3 * dim)),
        "wo":   nrm(ks[3], (num_layers, dim, dim)),
        "bo":   nrm(ks[4], (num_layers, 1, dim)),
        "ln2g": jnp.ones((num_layers, 1, dim), jnp.float32),
        "ln2b": jnp.zeros((num_layers, 1, dim), jnp.float32),
        "w1":   nrm(ks[5], (num_layers, dim, ff_dim)),
        "b1":   nrm(ks[6], (num_layers, 1, ff_dim)),
        "w2":   nrm(ks[7], (num_layers, ff_dim, dim)),
        "b2":   nrm(ks[8], (num_layers, 1, dim)),
    }


# ------------------------------------ main ------------------------------------

if __name__ == "__main__":
    B, S, D, F, H, L = 2, 8, 32, 64, 4, 2   # batch, seq, dim, ff_dim, heads, layers

    key = jax.random.PRNGKey(0)
    kx, kp = jax.random.split(key)
    x = jax.random.normal(kx, (B, S, D), dtype=jnp.float32)
    params = init_params(kp, S, L, D, F)

    # TODO(synk): dropout layers are identity here (eval mode); no RNG dropout in kernel.
    out = encoder_forward(x, params, H)
    out = jax.block_until_ready(out)

    ref = encoder_ref(x, params, H)
    assert out.shape == (B, S, D)
    max_err = float(jnp.max(jnp.abs(out - ref)))
    # bf16 matmul operands + approx (EUP) reciprocal in softmax => relaxed tolerance
    # vs the f32 PyTorch-semantics reference.
    assert jnp.allclose(out, ref, atol=2e-2, rtol=2e-2), max_err

    print("KERNEL_OK")
</pallas_src>

<mosaic_0001>
module attributes {stable_mosaic.version = 11 : i64} {
  func.func @kernel(%arg0: i32, %arg1: memref<16x32xf32, #tpu.memory_space<vmem>>, %arg2: memref<8x32xf32, #tpu.memory_space<vmem>>, %arg3: memref<1x1x32xf32, #tpu.memory_space<vmem>>, %arg4: memref<1x1x32xf32, #tpu.memory_space<vmem>>, %arg5: memref<1x32x96xbf16, #tpu.memory_space<vmem>>, %arg6: memref<1x1x96xf32, #tpu.memory_space<vmem>>, %arg7: memref<1x32x32xbf16, #tpu.memory_space<vmem>>, %arg8: memref<1x1x32xf32, #tpu.memory_space<vmem>>, %arg9: memref<1x1x32xf32, #tpu.memory_space<vmem>>, %arg10: memref<1x1x32xf32, #tpu.memory_space<vmem>>, %arg11: memref<1x32x64xbf16, #tpu.memory_space<vmem>>, %arg12: memref<1x1x64xf32, #tpu.memory_space<vmem>>, %arg13: memref<1x64x32xbf16, #tpu.memory_space<vmem>>, %arg14: memref<1x1x32xf32, #tpu.memory_space<vmem>>, %arg15: memref<1x32xf32, #tpu.memory_space<vmem>>, %arg16: memref<1x32xf32, #tpu.memory_space<vmem>>, %arg17: memref<16x32xf32, #tpu.memory_space<vmem>>, %arg18: memref<16x32xf32, #tpu.memory_space<vmem>>, %arg19: memref<16x32xf32, #tpu.memory_space<vmem>>) attributes {dimension_semantics = [#tpu.dimension_semantics<arbitrary>], iteration_bounds = array<i64: 2>, scalar_prefetch = 0 : i64, scratch_operands = 2 : i64, tpu.core_type = #tpu.core_type<tc>, window_params = [{pipeline_mode = #tpu.pipeline_mode<synchronous>, transform_indices = @transform_0, window_bounds = array<i64: 16, 32>}, {pipeline_mode = #tpu.pipeline_mode<synchronous>, transform_indices = @transform_1, window_bounds = array<i64: 8, 32>}, {transform_indices = @transform_2, window_bounds = array<i64: 1, 1, 32>}, {transform_indices = @transform_3, window_bounds = array<i64: 1, 1, 32>}, {transform_indices = @transform_4, window_bounds = array<i64: 1, 32, 96>}, {transform_indices = @transform_5, window_bounds = array<i64: 1, 1, 96>}, {transform_indices = @transform_6, window_bounds = array<i64: 1, 32, 32>}, {transform_indices = @transform_7, window_bounds = array<i64: 1, 1, 32>}, {transform_indices = @transform_8, window_bounds = array<i64: 1, 1, 32>}, {transform_indices = @transform_9, window_bounds = array<i64: 1, 1, 32>}, {transform_indices = @transform_10, window_bounds = array<i64: 1, 32, 64>}, {transform_indices = @transform_11, window_bounds = array<i64: 1, 1, 64>}, {transform_indices = @transform_12, window_bounds = array<i64: 1, 64, 32>}, {transform_indices = @transform_13, window_bounds = array<i64: 1, 1, 32>}, {pipeline_mode = #tpu.pipeline_mode<synchronous>, transform_indices = @transform_14, window_bounds = array<i64: 1, 32>}, {pipeline_mode = #tpu.pipeline_mode<synchronous>, transform_indices = @transform_15, window_bounds = array<i64: 1, 32>}, {pipeline_mode = #tpu.pipeline_mode<synchronous>, transform_indices = @transform_16, window_bounds = array<i64: 16, 32>}]} {
    %c0_i32 = arith.constant 0 : i32
    %0 = arith.cmpi eq, %arg0, %c0_i32 : i32
    %1 = arith.extui %0 : i1 to i32
    %c0_i32_0 = arith.constant 0 : i32
    %2 = arith.cmpi ne, %1, %c0_i32_0 : i32
    scf.if %2 {
      %c0_84 = arith.constant 0 : index
      %c0_85 = arith.constant 0 : index
      %196 = vector.load %arg1[%c0_84, %c0_85] : memref<16x32xf32, #tpu.memory_space<vmem>>, vector<16x32xf32>
      %197 = vector.shape_cast %196 : vector<16x32xf32> to vector<2x8x32xf32>
      %c0_86 = arith.constant 0 : index
      %c0_87 = arith.constant 0 : index
      %198 = vector.load %arg2[%c0_86, %c0_87] : memref<8x32xf32, #tpu.memory_space<vmem>>, vector<8x32xf32>
      %199 = vector.shape_cast %198 : vector<8x32xf32> to vector<1x8x32xf32>
      %200 = vector.broadcast %199 : vector<1x8x32xf32> to vector<2x8x32xf32>
      %201 = arith.addf %197, %200 : vector<2x8x32xf32>
      %202 = vector.shape_cast %201 : vector<2x8x32xf32> to vector<16x32xf32>
      %c0_88 = arith.constant 0 : index
      %c0_89 = arith.constant 0 : index
      %203 = vector.load %arg18[%c0_88, %c0_89] : memref<16x32xf32, #tpu.memory_space<vmem>>, vector<16x32xf32>
      tpu.vector_store %arg18[%c0_88, %c0_89], %202 {strides = array<i32>} : memref<16x32xf32, #tpu.memory_space<vmem>>, vector<16x32xf32>,
    } else {
    }
    %c0 = arith.constant 0 : index
    %c0_1 = arith.constant 0 : index
    %3 = vector.load %arg18[%c0, %c0_1] : memref<16x32xf32, #tpu.memory_space<vmem>>, vector<16x32xf32>
    %c0_2 = arith.constant 0 : index
    %c0_3 = arith.constant 0 : index
    %c0_4 = arith.constant 0 : index
    %4 = vector.load %arg3[%c0_2, %c0_3, %c0_4] : memref<1x1x32xf32, #tpu.memory_space<vmem>>, vector<1x1x32xf32>
    %5 = vector.shape_cast %4 : vector<1x1x32xf32> to vector<1x32xf32>
    %c0_5 = arith.constant 0 : index
    %c0_6 = arith.constant 0 : index
    %c0_7 = arith.constant 0 : index
    %6 = vector.load %arg4[%c0_5, %c0_6, %c0_7] : memref<1x1x32xf32, #tpu.memory_space<vmem>>, vector<1x1x32xf32>
    %7 = vector.shape_cast %6 : vector<1x1x32xf32> to vector<1x32xf32>
    %cst = arith.constant dense<0.000000e+00> : vector<16xf32>
    %8 = vector.multi_reduction <add>, %3, %cst [1] : vector<16x32xf32> to vector<16xf32>
    %9 = vector.shape_cast %8 : vector<16xf32> to vector<16x1xf32>
    %cst_8 = arith.constant 3.200000e+01 : f32
    %10 = vector.broadcast %cst_8 : f32 to vector<16x1xf32>
    %11 = arith.divf %9, %10 : vector<16x1xf32>
    %12 = vector.broadcast %11 : vector<16x1xf32> to vector<16x32xf32>
    %13 = arith.subf %3, %12 : vector<16x32xf32>
    %14 = arith.mulf %13, %13 : vector<16x32xf32>
    %cst_9 = arith.constant dense<0.000000e+00> : vector<16xf32>
    %15 = vector.multi_reduction <add>, %14, %cst_9 [1] : vector<16x32xf32> to vector<16xf32>
    %16 = vector.shape_cast %15 : vector<16xf32> to vector<16x1xf32>
    %cst_10 = arith.constant 3.200000e+01 : f32
    %17 = vector.broadcast %cst_10 : f32 to vector<16x1xf32>
    %18 = arith.divf %16, %17 : vector<16x1xf32>
    %19 = vector.broadcast %11 : vector<16x1xf32> to vector<16x32xf32>
    %20 = arith.subf %3, %19 : vector<16x32xf32>
    %cst_11 = arith.constant 9.99999997E-7 : f32
    %21 = vector.broadcast %cst_11 : f32 to vector<16x1xf32>
    %22 = arith.addf %18, %21 : vector<16x1xf32>
    %23 = math.rsqrt %22 : vector<16x1xf32>
    %24 = vector.broadcast %23 : vector<16x1xf32> to vector<16x32xf32>
    %25 = arith.mulf %20, %24 : vector<16x32xf32>
    %26 = vector.broadcast %5 : vector<1x32xf32> to vector<16x32xf32>
    %27 = arith.mulf %25, %26 : vector<16x32xf32>
    %28 = vector.broadcast %7 : vector<1x32xf32> to vector<16x32xf32>
    %29 = arith.addf %27, %28 : vector<16x32xf32>
    %30 = arith.truncf %29 : vector<16x32xf32> to vector<16x32xbf16>
    %c0_12 = arith.constant 0 : index
    %c0_13 = arith.constant 0 : index
    %c0_14 = arith.constant 0 : index
    %31 = vector.load %arg5[%c0_12, %c0_13, %c0_14] : memref<1x32x96xbf16, #tpu.memory_space<vmem>>, vector<1x32x96xbf16>
    %32 = vector.shape_cast %31 : vector<1x32x96xbf16> to vector<32x96xbf16>
    %cst_15 = arith.constant dense<0.000000e+00> : vector<16x96xf32>
    %33 = tpu.matmul %30, %32, %cst_15 {dimension_numbers = #tpu.dot_dimension_numbers<[1], [0], [0], [1], [0, 0, 1, 1], [], []>} : vector<16x32xbf16>, vector<32x96xbf16>, vector<16x96xf32> -> vector<16x96xf32>
    %c0_16 = arith.constant 0 : index
    %c0_17 = arith.constant 0 : index
    %c0_18 = arith.constant 0 : index
    %34 = vector.load %arg6[%c0_16, %c0_17, %c0_18] : memref<1x1x96xf32, #tpu.memory_space<vmem>>, vector<1x1x96xf32>
    %35 = vector.shape_cast %34 : vector<1x1x96xf32> to vector<1x96xf32>
    %36 = vector.broadcast %35 : vector<1x96xf32> to vector<16x96xf32>
    %37 = arith.addf %33, %36 : vector<16x96xf32>
    %38 = vector.shape_cast %37 : vector<16x96xf32> to vector<2x8x96xf32>
    %39 = vector.extract_strided_slice %38 {offsets = [0, 0, 0], sizes = [2, 8, 8], strides = [1, 1, 1]} : vector<2x8x96xf32> to vector<2x8x8xf32>
    %cst_19 = arith.constant 0.353553385 : f32
    %40 = vector.broadcast %cst_19 : f32 to vector<2x8x8xf32>
    %41 = arith.mulf %39, %40 : vector<2x8x8xf32>
    %42 = arith.truncf %41 : vector<2x8x8xf32> to vector<2x8x8xbf16>
    %43 = vector.extract_strided_slice %38 {offsets = [0, 0, 32], sizes = [2, 8, 8], strides = [1, 1, 1]} : vector<2x8x96xf32> to vector<2x8x8xf32>
    %44 = arith.truncf %43 : vector<2x8x8xf32> to vector<2x8x8xbf16>
    %45 = vector.extract_strided_slice %38 {offsets = [0, 0, 64], sizes = [2, 8, 8], strides = [1, 1, 1]} : vector<2x8x96xf32> to vector<2x8x8xf32>
    %46 = arith.truncf %45 : vector<2x8x8xf32> to vector<2x8x8xbf16>
    "tpu.trace_start"() <{level = 10 : i32, message = "bqd,bkd->bqk"}> : () -> ()
    %cst_20 = arith.constant dense<0.000000e+00> : vector<2x8x8xf32>
    %47 = tpu.matmul %42, %44, %cst_20 {dimension_numbers = #tpu.dot_dimension_numbers<[2], [2], [1], [1], [0, 0, 0, 1, 1, 1], [0], [0]>} : vector<2x8x8xbf16>, vector<2x8x8xbf16>, vector<2x8x8xf32> -> vector<2x8x8xf32>
    "tpu.trace_stop"() : () -> ()
    %cst_21 = arith.constant dense<0xFF800000> : vector<2x8xf32>
    %48 = vector.multi_reduction <maximumf>, %47, %cst_21 [2] : vector<2x8x8xf32> to vector<2x8xf32>
    %49 = vector.shape_cast %48 : vector<2x8xf32> to vector<2x8x1xf32>
    %50 = vector.broadcast %49 : vector<2x8x1xf32> to vector<2x8x8xf32>
    %51 = arith.subf %47, %50 : vector<2x8x8xf32>
    %52 = math.exp %51 : vector<2x8x8xf32>
    %cst_22 = arith.constant dense<0.000000e+00> : vector<2x8xf32>
    %53 = vector.multi_reduction <add>, %52, %cst_22 [2] : vector<2x8x8xf32> to vector<2x8xf32>
    %54 = vector.shape_cast %53 : vector<2x8xf32> to vector<2x8x1xf32>
    %55 = tpu.reciprocal %54 {approx = true} : vector<2x8x1xf32> -> vector<2x8x1xf32>
    %56 = vector.broadcast %55 : vector<2x8x1xf32> to vector<2x8x8xf32>
    %57 = arith.mulf %52, %56 : vector<2x8x8xf32>
    %58 = arith.truncf %57 : vector<2x8x8xf32> to vector<2x8x8xbf16>
    "tpu.trace_start"() <{level = 10 : i32, message = "bqk,bkd->bqd"}> : () -> ()
    %cst_23 = arith.constant dense<0.000000e+00> : vector<2x8x8xf32>
    %59 = tpu.matmul %58, %46, %cst_23 {dimension_numbers = #tpu.dot_dimension_numbers<[2], [1], [1], [2], [0, 0, 0, 1, 1, 2], [0], [0]>} : vector<2x8x8xbf16>, vector<2x8x8xbf16>, vector<2x8x8xf32> -> vector<2x8x8xf32>
    "tpu.trace_stop"() : () -> ()
    %60 = vector.shape_cast %59 : vector<2x8x8xf32> to vector<16x8xf32>
    %c0_24 = arith.constant 0 : index
    %c0_25 = arith.constant 0 : index
    %61 = vector.load %arg19[%c0_24, %c0_25] : memref<16x32xf32, #tpu.memory_space<vmem>>, vector<16x8xf32>
    tpu.vector_store %arg19[%c0_24, %c0_25], %60 {strides = array<i32>} : memref<16x32xf32, #tpu.memory_space<vmem>>, vector<16x8xf32>,
    %62 = vector.extract_strided_slice %38 {offsets = [0, 0, 8], sizes = [2, 8, 8], strides = [1, 1, 1]} : vector<2x8x96xf32> to vector<2x8x8xf32>
    %cst_26 = arith.constant 0.353553385 : f32
    %63 = vector.broadcast %cst_26 : f32 to vector<2x8x8xf32>
    %64 = arith.mulf %62, %63 : vector<2x8x8xf32>
    %65 = arith.truncf %64 : vector<2x8x8xf32> to vector<2x8x8xbf16>
    %66 = vector.extract_strided_slice %38 {offsets = [0, 0, 40], sizes = [2, 8, 8], strides = [1, 1, 1]} : vector<2x8x96xf32> to vector<2x8x8xf32>
    %67 = arith.truncf %66 : vector<2x8x8xf32> to vector<2x8x8xbf16>
    %68 = vector.extract_strided_slice %38 {offsets = [0, 0, 72], sizes = [2, 8, 8], strides = [1, 1, 1]} : vector<2x8x96xf32> to vector<2x8x8xf32>
    %69 = arith.truncf %68 : vector<2x8x8xf32> to vector<2x8x8xbf16>
    "tpu.trace_start"() <{level = 10 : i32, message = "bqd,bkd->bqk"}> : () -> ()
    %cst_27 = arith.constant dense<0.000000e+00> : vector<2x8x8xf32>
    %70 = tpu.matmul %65, %67, %cst_27 {dimension_numbers = #tpu.dot_dimension_numbers<[2], [2], [1], [1], [0, 0, 0, 1, 1, 1], [0], [0]>} : vector<2x8x8xbf16>, vector<2x8x8xbf16>, vector<2x8x8xf32> -> vector<2x8x8xf32>
    "tpu.trace_stop"() : () -> ()
    %cst_28 = arith.constant dense<0xFF800000> : vector<2x8xf32>
    %71 = vector.multi_reduction <maximumf>, %70, %cst_28 [2] : vector<2x8x8xf32> to vector<2x8xf32>
    %72 = vector.shape_cast %71 : vector<2x8xf32> to vector<2x8x1xf32>
    %73 = vector.broadcast %72 : vector<2x8x1xf32> to vector<2x8x8xf32>
    %74 = arith.subf %70, %73 : vector<2x8x8xf32>
    %75 = math.exp %74 : vector<2x8x8xf32>
    %cst_29 = arith.constant dense<0.000000e+00> : vector<2x8xf32>
    %76 = vector.multi_reduction <add>, %75, %cst_29 [2] : vector<2x8x8xf32> to vector<2x8xf32>
    %77 = vector.shape_cast %76 : vector<2x8xf32> to vector<2x8x1xf32>
    %78 = tpu.reciprocal %77 {approx = true} : vector<2x8x1xf32> -> vector<2x8x1xf32>
    %79 = vector.broadcast %78 : vector<2x8x1xf32> to vector<2x8x8xf32>
    %80 = arith.mulf %75, %79 : vector<2x8x8xf32>
    %81 = arith.truncf %80 : vector<2x8x8xf32> to vector<2x8x8xbf16>
    "tpu.trace_start"() <{level = 10 : i32, message = "bqk,bkd->bqd"}> : () -> ()
    %cst_30 = arith.constant dense<0.000000e+00> : vector<2x8x8xf32>
    %82 = tpu.matmul %81, %69, %cst_30 {dimension_numbers = #tpu.dot_dimension_numbers<[2], [1], [1], [2], [0, 0, 0, 1, 1, 2], [0], [0]>} : vector<2x8x8xbf16>, vector<2x8x8xbf16>, vector<2x8x8xf32> -> vector<2x8x8xf32>
    "tpu.trace_stop"() : () -> ()
    %83 = vector.shape_cast %82 : vector<2x8x8xf32> to vector<16x8xf32>
    %c0_31 = arith.constant 0 : index
    %c8 = arith.constant 8 : index
    %84 = vector.load %arg19[%c0_31, %c8] : memref<16x32xf32, #tpu.memory_space<vmem>>, vector<16x8xf32>
    tpu.vector_store %arg19[%c0_31, %c8], %83 {strides = array<i32>} : memref<16x32xf32, #tpu.memory_space<vmem>>, vector<16x8xf32>,
    %85 = vector.extract_strided_slice %38 {offsets = [0, 0, 16], sizes = [2, 8, 8], strides = [1, 1, 1]} : vector<2x8x96xf32> to vector<2x8x8xf32>
    %cst_32 = arith.constant 0.353553385 : f32
    %86 = vector.broadcast %cst_32 : f32 to vector<2x8x8xf32>
    %87 = arith.mulf %85, %86 : vector<2x8x8xf32>
    %88 = arith.truncf %87 : vector<2x8x8xf32> to vector<2x8x8xbf16>
    %89 = vector.extract_strided_slice %38 {offsets = [0, 0, 48], sizes = [2, 8, 8], strides = [1, 1, 1]} : vector<2x8x96xf32> to vector<2x8x8xf32>
    %90 = arith.truncf %89 : vector<2x8x8xf32> to vector<2x8x8xbf16>
    %91 = vector.extract_strided_slice %38 {offsets = [0, 0, 80], sizes = [2, 8, 8], strides = [1, 1, 1]} : vector<2x8x96xf32> to vector<2x8x8xf32>
    %92 = arith.truncf %91 : vector<2x8x8xf32> to vector<2x8x8xbf16>
    "tpu.trace_start"() <{level = 10 : i32, message = "bqd,bkd->bqk"}> : () -> ()
    %cst_33 = arith.constant dense<0.000000e+00> : vector<2x8x8xf32>
    %93 = tpu.matmul %88, %90, %cst_33 {dimension_numbers = #tpu.dot_dimension_numbers<[2], [2], [1], [1], [0, 0, 0, 1, 1, 1], [0], [0]>} : vector<2x8x8xbf16>, vector<2x8x8xbf16>, vector<2x8x8xf32> -> vector<2x8x8xf32>
    "tpu.trace_stop"() : () -> ()
    %cst_34 = arith.constant dense<0xFF800000> : vector<2x8xf32>
    %94 = vector.multi_reduction <maximumf>, %93, %cst_34 [2] : vector<2x8x8xf32> to vector<2x8xf32>
    %95 = vector.shape_cast %94 : vector<2x8xf32> to vector<2x8x1xf32>
    %96 = vector.broadcast %95 : vector<2x8x1xf32> to vector<2x8x8xf32>
    %97 = arith.subf %93, %96 : vector<2x8x8xf32>
    %98 = math.exp %97 : vector<2x8x8xf32>
    %cst_35 = arith.constant dense<0.000000e+00> : vector<2x8xf32>
    %99 = vector.multi_reduction <add>, %98, %cst_35 [2] : vector<2x8x8xf32> to vector<2x8xf32>
    %100 = vector.shape_cast %99 : vector<2x8xf32> to vector<2x8x1xf32>
    %101 = tpu.reciprocal %100 {approx = true} : vector<2x8x1xf32> -> vector<2x8x1xf32>
    %102 = vector.broadcast %101 : vector<2x8x1xf32> to vector<2x8x8xf32>
    %103 = arith.mulf %98, %102 : vector<2x8x8xf32>
    %104 = arith.truncf %103 : vector<2x8x8xf32> to vector<2x8x8xbf16>
    "tpu.trace_start"() <{level = 10 : i32, message = "bqk,bkd->bqd"}> : () -> ()
    %cst_36 = arith.constant dense<0.000000e+00> : vector<2x8x8xf32>
    %105 = tpu.matmul %104, %92, %cst_36 {dimension_numbers = #tpu.dot_dimension_numbers<[2], [1], [1], [2], [0, 0, 0, 1, 1, 2], [0], [0]>} : vector<2x8x8xbf16>, vector<2x8x8xbf16>, vector<2x8x8xf32> -> vector<2x8x8xf32>
    "tpu.trace_stop"() : () -> ()
    %106 = vector.shape_cast %105 : vector<2x8x8xf32> to vector<16x8xf32>
    %c0_37 = arith.constant 0 : index
    %c16 = arith.constant 16 : index
    %107 = vector.load %arg19[%c0_37, %c16] : memref<16x32xf32, #tpu.memory_space<vmem>>, vector<16x8xf32>
    tpu.vector_store %arg19[%c0_37, %c16], %106 {strides = array<i32>} : memref<16x32xf32, #tpu.memory_space<vmem>>, vector<16x8xf32>,
    %108 = vector.extract_strided_slice %38 {offsets = [0, 0, 24], sizes = [2, 8, 8], strides = [1, 1, 1]} : vector<2x8x96xf32> to vector<2x8x8xf32>
    %cst_38 = arith.constant 0.353553385 : f32
    %109 = vector.broadcast %cst_38 : f32 to vector<2x8x8xf32>
    %110 = arith.mulf %108, %109 : vector<2x8x8xf32>
    %111 = arith.truncf %110 : vector<2x8x8xf32> to vector<2x8x8xbf16>
    %112 = vector.extract_strided_slice %38 {offsets = [0, 0, 56], sizes = [2, 8, 8], strides = [1, 1, 1]} : vector<2x8x96xf32> to vector<2x8x8xf32>
    %113 = arith.truncf %112 : vector<2x8x8xf32> to vector<2x8x8xbf16>
    %114 = vector.extract_strided_slice %38 {offsets = [0, 0, 88], sizes = [2, 8, 8], strides = [1, 1, 1]} : vector<2x8x96xf32> to vector<2x8x8xf32>
    %115 = arith.truncf %114 : vector<2x8x8xf32> to vector<2x8x8xbf16>
    "tpu.trace_start"() <{level = 10 : i32, message = "bqd,bkd->bqk"}> : () -> ()
    %cst_39 = arith.constant dense<0.000000e+00> : vector<2x8x8xf32>
    %116 = tpu.matmul %111, %113, %cst_39 {dimension_numbers = #tpu.dot_dimension_numbers<[2], [2], [1], [1], [0, 0, 0, 1, 1, 1], [0], [0]>} : vector<2x8x8xbf16>, vector<2x8x8xbf16>, vector<2x8x8xf32> -> vector<2x8x8xf32>
    "tpu.trace_stop"() : () -> ()
    %cst_40 = arith.constant dense<0xFF800000> : vector<2x8xf32>
    %117 = vector.multi_reduction <maximumf>, %116, %cst_40 [2] : vector<2x8x8xf32> to vector<2x8xf32>
    %118 = vector.shape_cast %117 : vector<2x8xf32> to vector<2x8x1xf32>
    %119 = vector.broadcast %118 : vector<2x8x1xf32> to vector<2x8x8xf32>
    %120 = arith.subf %116, %119 : vector<2x8x8xf32>
    %121 = math.exp %120 : vector<2x8x8xf32>
    %cst_41 = arith.constant dense<0.000000e+00> : vector<2x8xf32>
    %122 = vector.multi_reduction <add>, %121, %cst_41 [2] : vector<2x8x8xf32> to vector<2x8xf32>
    %123 = vector.shape_cast %122 : vector<2x8xf32> to vector<2x8x1xf32>
    %124 = tpu.reciprocal %123 {approx = true} : vector<2x8x1xf32> -> vector<2x8x1xf32>
    %125 = vector.broadcast %124 : vector<2x8x1xf32> to vector<2x8x8xf32>
    %126 = arith.mulf %121, %125 : vector<2x8x8xf32>
    %127 = arith.truncf %126 : vector<2x8x8xf32> to vector<2x8x8xbf16>
    "tpu.trace_start"() <{level = 10 : i32, message = "bqk,bkd->bqd"}> : () -> ()
    %cst_42 = arith.constant dense<0.000000e+00> : vector<2x8x8xf32>
    %128 = tpu.matmul %127, %115, %cst_42 {dimension_numbers = #tpu.dot_dimension_numbers<[2], [1], [1], [2], [0, 0, 0, 1, 1, 2], [0], [0]>} : vector<2x8x8xbf16>, vector<2x8x8xbf16>, vector<2x8x8xf32> -> vector<2x8x8xf32>
    "tpu.trace_stop"() : () -> ()
    %129 = vector.shape_cast %128 : vector<2x8x8xf32> to vector<16x8xf32>
    %c0_43 = arith.constant 0 : index
    %c24 = arith.constant 24 : index
    %130 = vector.load %arg19[%c0_43, %c24] : memref<16x32xf32, #tpu.memory_space<vmem>>, vector<16x8xf32>
    tpu.vector_store %arg19[%c0_43, %c24], %129 {strides = array<i32>} : memref<16x32xf32, #tpu.memory_space<vmem>>, vector<16x8xf32>,
    %c0_44 = arith.constant 0 : index
    %c0_45 = arith.constant 0 : index
    %131 = vector.load %arg19[%c0_44, %c0_45] : memref<16x32xf32, #tpu.memory_space<vmem>>, vector<16x32xf32>
    %132 = arith.truncf %131 : vector<16x32xf32> to vector<16x32xbf16>
    %c0_46 = arith.constant 0 : index
    %c0_47 = arith.constant 0 : index
    %c0_48 = arith.constant 0 : index
    %133 = vector.load %arg7[%c0_46, %c0_47, %c0_48] : memref<1x32x32xbf16, #tpu.memory_space<vmem>>, vector<1x32x32xbf16>
    %134 = vector.shape_cast %133 : vector<1x32x32xbf16> to vector<32x32xbf16>
    %cst_49 = arith.constant dense<0.000000e+00> : vector<16x32xf32>
    %135 = tpu.matmul %132, %134, %cst_49 {dimension_numbers = #tpu.dot_dimension_numbers<[1], [0], [0], [1], [0, 0, 1, 1], [], []>} : vector<16x32xbf16>, vector<32x32xbf16>, vector<16x32xf32> -> vector<16x32xf32>
    %c0_50 = arith.constant 0 : index
    %c0_51 = arith.constant 0 : index
    %c0_52 = arith.constant 0 : index
    %136 = vector.load %arg8[%c0_50, %c0_51, %c0_52] : memref<1x1x32xf32, #tpu.memory_space<vmem>>, vector<1x1x32xf32>
    %137 = vector.shape_cast %136 : vector<1x1x32xf32> to vector<1x32xf32>
    %138 = vector.broadcast %137 : vector<1x32xf32> to vector<16x32xf32>
    %139 = arith.addf %135, %138 : vector<16x32xf32>
    %140 = arith.addf %3, %139 : vector<16x32xf32>
    %c0_53 = arith.constant 0 : index
    %c0_54 = arith.constant 0 : index
    %c0_55 = arith.constant 0 : index
    %141 = vector.load %arg9[%c0_53, %c0_54, %c0_55] : memref<1x1x32xf32, #tpu.memory_space<vmem>>, vector<1x1x32xf32>
    %142 = vector.shape_cast %141 : vector<1x1x32xf32> to vector<1x32xf32>
    %c0_56 = arith.constant 0 : index
    %c0_57 = arith.constant 0 : index
    %c0_58 = arith.constant 0 : index
    %143 = vector.load %arg10[%c0_56, %c0_57, %c0_58] : memref<1x1x32xf32, #tpu.memory_space<vmem>>, vector<1x1x32xf32>
    %144 = vector.shape_cast %143 : vector<1x1x32xf32> to vector<1x32xf32>
    %cst_59 = arith.constant dense<0.000000e+00> : vector<16xf32>
    %145 = vector.multi_reduction <add>, %140, %cst_59 [1] : vector<16x32xf32> to vector<16xf32>
    %146 = vector.shape_cast %145 : vector<16xf32> to vector<16x1xf32>
    %cst_60 = arith.constant 3.200000e+01 : f32
    %147 = vector.broadcast %cst_60 : f32 to vector<16x1xf32>
    %148 = arith.divf %146, %147 : vector<16x1xf32>
    %149 = vector.broadcast %148 : vector<16x1xf32> to vector<16x32xf32>
    %150 = arith.subf %140, %149 : vector<16x32xf32>
    %151 = arith.mulf %150, %150 : vector<16x32xf32>
    %cst_61 = arith.constant dense<0.000000e+00> : vector<16xf32>
    %152 = vector.multi_reduction <add>, %151, %cst_61 [1] : vector<16x32xf32> to vector<16xf32>
    %153 = vector.shape_cast %152 : vector<16xf32> to vector<16x1xf32>
    %cst_62 = arith.constant 3.200000e+01 : f32
    %154 = vector.broadcast %cst_62 : f32 to vector<16x1xf32>
    %155 = arith.divf %153, %154 : vector<16x1xf32>
    %156 = vector.broadcast %148 : vector<16x1xf32> to vector<16x32xf32>
    %157 = arith.subf %140, %156 : vector<16x32xf32>
    %cst_63 = arith.constant 9.99999997E-7 : f32
    %158 = vector.broadcast %cst_63 : f32 to vector<16x1xf32>
    %159 = arith.addf %155, %158 : vector<16x1xf32>
    %160 = math.rsqrt %159 : vector<16x1xf32>
    %161 = vector.broadcast %160 : vector<16x1xf32> to vector<16x32xf32>
    %162 = arith.mulf %157, %161 : vector<16x32xf32>
    %163 = vector.broadcast %142 : vector<1x32xf32> to vector<16x32xf32>
    %164 = arith.mulf %162, %163 : vector<16x32xf32>
    %165 = vector.broadcast %144 : vector<1x32xf32> to vector<16x32xf32>
    %166 = arith.addf %164, %165 : vector<16x32xf32>
    %167 = arith.truncf %166 : vector<16x32xf32> to vector<16x32xbf16>
    %c0_64 = arith.constant 0 : index
    %c0_65 = arith.constant 0 : index
    %c0_66 = arith.constant 0 : index
    %168 = vector.load %arg11[%c0_64, %c0_65, %c0_66] : memref<1x32x64xbf16, #tpu.memory_space<vmem>>, vector<1x32x64xbf16>
    %169 = vector.shape_cast %168 : vector<1x32x64xbf16> to vector<32x64xbf16>
    %cst_67 = arith.constant dense<0.000000e+00> : vector<16x64xf32>
    %170 = tpu.matmul %167, %169, %cst_67 {dimension_numbers = #tpu.dot_dimension_numbers<[1], [0], [0], [1], [0, 0, 1, 1], [], []>} : vector<16x32xbf16>, vector<32x64xbf16>, vector<16x64xf32> -> vector<16x64xf32>
    %c0_68 = arith.constant 0 : index
    %c0_69 = arith.constant 0 : index
    %c0_70 = arith.constant 0 : index
    %171 = vector.load %arg12[%c0_68, %c0_69, %c0_70] : memref<1x1x64xf32, #tpu.memory_space<vmem>>, vector<1x1x64xf32>
    %172 = vector.shape_cast %171 : vector<1x1x64xf32> to vector<1x64xf32>
    %173 = vector.broadcast %172 : vector<1x64xf32> to vector<16x64xf32>
    %174 = arith.addf %170, %173 : vector<16x64xf32>
    %cst_71 = arith.constant 5.000000e-01 : f32
    %175 = vector.broadcast %cst_71 : f32 to vector<16x64xf32>
    %176 = arith.mulf %175, %174 : vector<16x64xf32>
    %cst_72 = arith.constant 0.707106769 : f32
    %177 = vector.broadcast %cst_72 : f32 to vector<16x64xf32>
    %178 = arith.mulf %174, %177 : vector<16x64xf32>
    %179 = math.erf %178 : vector<16x64xf32>
    %cst_73 = arith.constant 1.000000e+00 : f32
    %180 = vector.broadcast %cst_73 : f32 to vector<16x64xf32>
    %181 = arith.addf %180, %179 : vector<16x64xf32>
    %182 = arith.mulf %176, %181 : vector<16x64xf32>
    %183 = arith.truncf %182 : vector<16x64xf32> to vector<16x64xbf16>
    %c0_74 = arith.constant 0 : index
    %c0_75 = arith.constant 0 : index
    %c0_76 = arith.constant 0 : index
    %184 = vector.load %arg13[%c0_74, %c0_75, %c0_76] : memref<1x64x32xbf16, #tpu.memory_space<vmem>>, vector<1x64x32xbf16>
    %185 = vector.shape_cast %184 : vector<1x64x32xbf16> to vector<64x32xbf16>
    %cst_77 = arith.constant dense<0.000000e+00> : vector<16x32xf32>
    %186 = tpu.matmul %183, %185, %cst_77 {dimension_numbers = #tpu.dot_dimension_numbers<[1], [0], [0], [1], [0, 0, 1, 1], [], []>} : vector<16x64xbf16>, vector<64x32xbf16>, vector<16x32xf32> -> vector<16x32xf32>
    %c0_78 = arith.constant 0 : index
    %c0_79 = arith.constant 0 : index
    %c0_80 = arith.constant 0 : index
    %187 = vector.load %arg14[%c0_78, %c0_79, %c0_80] : memref<1x1x32xf32, #tpu.memory_space<vmem>>, vector<1x1x32xf32>
    %188 = vector.shape_cast %187 : vector<1x1x32xf32> to vector<1x32xf32>
    %189 = vector.broadcast %188 : vector<1x32xf32> to vector<16x32xf32>
    %190 = arith.addf %186, %189 : vector<16x32xf32>
    %191 = arith.addf %140, %190 : vector<16x32xf32>
    %c0_81 = arith.constant 0 : index
    %c0_82 = arith.constant 0 : index
    %192 = vector.load %arg18[%c0_81, %c0_82] : memref<16x32xf32, #tpu.memory_space<vmem>>, vector<16x32xf32>
    tpu.vector_store %arg18[%c0_81, %c0_82], %191 {strides = array<i32>} : memref<16x32xf32, #tpu.memory_space<vmem>>, vector<16x32xf32>,
    %c1_i32 = arith.constant 1 : i32
    %193 = arith.cmpi eq, %arg0, %c1_i32 : i32
    %194 = arith.extui %193 : i1 to i32
    %c0_i32_83 = arith.constant 0 : i32
    %195 = arith.cmpi ne, %194, %c0_i32_83 : i32
    scf.if %195 {
      %c0_84 = arith.constant 0 : index
      %c0_85 = arith.constant 0 : index
      %196 = vector.load %arg15[%c0_84, %c0_85] : memref<1x32xf32, #tpu.memory_space<vmem>>, vector<1x32xf32>
      %c0_86 = arith.constant 0 : index
      %c0_87 = arith.constant 0 : index
      %197 = vector.load %arg16[%c0_86, %c0_87] : memref<1x32xf32, #tpu.memory_space<vmem>>, vector<1x32xf32>
      %cst_88 = arith.constant dense<0.000000e+00> : vector<16xf32>
      %198 = vector.multi_reduction <add>, %191, %cst_88 [1] : vector<16x32xf32> to vector<16xf32>
      %199 = vector.shape_cast %198 : vector<16xf32> to vector<16x1xf32>
      %cst_89 = arith.constant 3.200000e+01 : f32
      %200 = vector.broadcast %cst_89 : f32 to vector<16x1xf32>
      %201 = arith.divf %199, %200 : vector<16x1xf32>
      %202 = vector.broadcast %201 : vector<16x1xf32> to vector<16x32xf32>
      %203 = arith.subf %191, %202 : vector<16x32xf32>
      %204 = arith.mulf %203, %203 : vector<16x32xf32>
      %cst_90 = arith.constant dense<0.000000e+00> : vector<16xf32>
      %205 = vector.multi_reduction <add>, %204, %cst_90 [1] : vector<16x32xf32> to vector<16xf32>
      %206 = vector.shape_cast %205 : vector<16xf32> to vector<16x1xf32>
      %cst_91 = arith.constant 3.200000e+01 : f32
      %207 = vector.broadcast %cst_91 : f32 to vector<16x1xf32>
      %208 = arith.divf %206, %207 : vector<16x1xf32>
      %209 = vector.broadcast %201 : vector<16x1xf32> to vector<16x32xf32>
      %210 = arith.subf %191, %209 : vector<16x32xf32>
      %cst_92 = arith.constant 9.99999997E-7 : f32
      %211 = vector.broadcast %cst_92 : f32 to vector<16x1xf32>
      %212 = arith.addf %208, %211 : vector<16x1xf32>
      %213 = math.rsqrt %212 : vector<16x1xf32>
      %214 = vector.broadcast %213 : vector<16x1xf32> to vector<16x32xf32>
      %215 = arith.mulf %210, %214 : vector<16x32xf32>
      %216 = vector.broadcast %196 : vector<1x32xf32> to vector<16x32xf32>
      %217 = arith.mulf %215, %216 : vector<16x32xf32>
      %218 = vector.broadcast %197 : vector<1x32xf32> to vector<16x32xf32>
      %219 = arith.addf %217, %218 : vector<16x32xf32>
      %c0_93 = arith.constant 0 : index
      %c0_94 = arith.constant 0 : index
      %220 = vector.load %arg17[%c0_93, %c0_94] : memref<16x32xf32, #tpu.memory_space<vmem>>, vector<16x32xf32>
      tpu.vector_store %arg17[%c0_93, %c0_94], %219 {strides = array<i32>} : memref<16x32xf32, #tpu.memory_space<vmem>>, vector<16x32xf32>,
    } else {
    }
    return
  }
  func.func @transform_0(%arg0: i32) -> (i32, i32) {
    %c0_i32 = arith.constant 0 : i32
    %c0_i32_0 = arith.constant 0 : i32
    %c0_i32_1 = arith.constant 0 : i32
    return %c0_i32, %c0_i32_0 : i32, i32
  }
  func.func @transform_1(%arg0: i32) -> (i32, i32) {
    %c0_i32 = arith.constant 0 : i32
    %c0_i32_0 = arith.constant 0 : i32
    %c0_i32_1 = arith.constant 0 : i32
    return %c0_i32, %c0_i32_0 : i32, i32
  }
  func.func @transform_2(%arg0: i32) -> (i32, i32, i32) {
    %c0_i32 = arith.constant 0 : i32
    %c0_i32_0 = arith.constant 0 : i32
    %c0_i32_1 = arith.constant 0 : i32
    return %arg0, %c0_i32, %c0_i32_0 : i32, i32, i32
  }
  func.func @transform_3(%arg0: i32) -> (i32, i32, i32) {
    %c0_i32 = arith.constant 0 : i32
    %c0_i32_0 = arith.constant 0 : i32
    %c0_i32_1 = arith.constant 0 : i32
    return %arg0, %c0_i32, %c0_i32_0 : i32, i32, i32
  }
  func.func @transform_4(%arg0: i32) -> (i32, i32, i32) {
    %c0_i32 = arith.constant 0 : i32
    %c0_i32_0 = arith.constant 0 : i32
    %c0_i32_1 = arith.constant 0 : i32
    return %arg0, %c0_i32, %c0_i32_0 : i32, i32, i32
  }
  func.func @transform_5(%arg0: i32) -> (i32, i32, i32) {
    %c0_i32 = arith.constant 0 : i32
    %c0_i32_0 = arith.constant 0 : i32
    %c0_i32_1 = arith.constant 0 : i32
    return %arg0, %c0_i32, %c0_i32_0 : i32, i32, i32
  }
  func.func @transform_6(%arg0: i32) -> (i32, i32, i32) {
    %c0_i32 = arith.constant 0 : i32
    %c0_i32_0 = arith.constant 0 : i32
    %c0_i32_1 = arith.constant 0 : i32
    return %arg0, %c0_i32, %c0_i32_0 : i32, i32, i32
  }
  func.func @transform_7(%arg0: i32) -> (i32, i32, i32) {
    %c0_i32 = arith.constant 0 : i32
    %c0_i32_0 = arith.constant 0 : i32
    %c0_i32_1 = arith.constant 0 : i32
    return %arg0, %c0_i32, %c0_i32_0 : i32, i32, i32
  }
  func.func @transform_8(%arg0: i32) -> (i32, i32, i32) {
    %c0_i32 = arith.constant 0 : i32
    %c0_i32_0 = arith.constant 0 : i32
    %c0_i32_1 = arith.constant 0 : i32
    return %arg0, %c0_i32, %c0_i32_0 : i32, i32, i32
  }
  func.func @transform_9(%arg0: i32) -> (i32, i32, i32) {
    %c0_i32 = arith.constant 0 : i32
    %c0_i32_0 = arith.constant 0 : i32
    %c0_i32_1 = arith.constant 0 : i32
    return %arg0, %c0_i32, %c0_i32_0 : i32, i32, i32
  }
  func.func @transform_10(%arg0: i32) -> (i32, i32, i32) {
    %c0_i32 = arith.constant 0 : i32
    %c0_i32_0 = arith.constant 0 : i32
    %c0_i32_1 = arith.constant 0 : i32
    return %arg0, %c0_i32, %c0_i32_0 : i32, i32, i32
  }
  func.func @transform_11(%arg0: i32) -> (i32, i32, i32) {
    %c0_i32 = arith.constant 0 : i32
    %c0_i32_0 = arith.constant 0 : i32
    %c0_i32_1 = arith.constant 0 : i32
    return %arg0, %c0_i32, %c0_i32_0 : i32, i32, i32
  }
  func.func @transform_12(%arg0: i32) -> (i32, i32, i32) {
    %c0_i32 = arith.constant 0 : i32
    %c0_i32_0 = arith.constant 0 : i32
    %c0_i32_1 = arith.constant 0 : i32
    return %arg0, %c0_i32, %c0_i32_0 : i32, i32, i32
  }
  func.func @transform_13(%arg0: i32) -> (i32, i32, i32) {
    %c0_i32 = arith.constant 0 : i32
    %c0_i32_0 = arith.constant 0 : i32
    %c0_i32_1 = arith.constant 0 : i32
    return %arg0, %c0_i32, %c0_i32_0 : i32, i32, i32
  }
  func.func @transform_14(%arg0: i32) -> (i32, i32) {
    %c0_i32 = arith.constant 0 : i32
    %c0_i32_0 = arith.constant 0 : i32
    %c0_i32_1 = arith.constant 0 : i32
    return %c0_i32, %c0_i32_0 : i32, i32
  }
  func.func @transform_15(%arg0: i32) -> (i32, i32) {
    %c0_i32 = arith.constant 0 : i32
    %c0_i32_0 = arith.constant 0 : i32
    %c0_i32_1 = arith.constant 0 : i32
    return %c0_i32, %c0_i32_0 : i32, i32
  }
  func.func @transform_16(%arg0: i32) -> (i32, i32) {
    %c0_i32 = arith.constant 0 : i32
    %c0_i32_0 = arith.constant 0 : i32
    %c0_i32_1 = arith.constant 0 : i32
    return %c0_i32, %c0_i32_0 : i32, i32
  }
}

</mosaic_0001>

<bundles_post_ra>
// kernel: tpu_custom_call.1
= control target key start
LH: loop header
LB: loop body
LE: loop exit
PB: predicated region body
PF: predicated region fallthrough
CT: control target
= control target key end

     0   :  { %s3461_s0 = inlined_call_operand.hbm [shape: f32[16,32], index: 0, kind: input, shape index: {}]   ;;  %s3462_s1 = inlined_call_operand.hbm [shape: f32[8,32], index: 1, kind: input, shape index: {}]   ;;  %s3463_s2 = inlined_call_operand.vmem [shape: f32[2,1,32], index: 2, kind: input, shape index: {}]   ;;  %s3464_s3 = inlined_call_operand.vmem [shape: f32[2,1,32], index: 3, kind: input, shape index: {}]   ;;  %s3465_s4 = inlined_call_operand.vmem [shape: bf16[2,32,96], index: 4, kind: input, shape index: {}]   ;;  %s3466_s5 = inlined_call_operand.vmem [shape: f32[2,1,96], index: 5, kind: input, shape index: {}]   ;;  %s3467_s6 = inlined_call_operand.vmem [shape: bf16[2,32,32], index: 6, kind: input, shape index: {}]   ;;  %s3468_s7 = inlined_call_operand.vmem [shape: f32[2,1,32], index: 7, kind: input, shape index: {}]   ;;  %s3469_s8 = inlined_call_operand.vmem [shape: f32[2,1,32], index: 8, kind: input, shape index: {}]   ;;  %s3470_s9 = inlined_call_operand.vmem [shape: f32[2,1,32], index: 9, kind: input, shape index: {}]   ;;  %s3471_s10 = inlined_call_operand.vmem [shape: bf16[2,32,64], index: 10, kind: input, shape index: {}]   ;;  %s3472_s11 = inlined_call_operand.hbm [shape: f32[2,1,64], index: 11, kind: input, shape index: {}]   ;;  %s3473_s12 = inlined_call_operand.vmem [shape: bf16[2,64,32], index: 12, kind: input, shape index: {}]   ;;  %s3474_s13 = inlined_call_operand.vmem [shape: f32[2,1,32], index: 13, kind: input, shape index: {}]   ;;  %s3475_s14 = inlined_call_operand.vmem [shape: f32[1,32], index: 14, kind: input, shape index: {}]   ;;  %s3476_s15 = inlined_call_operand.vmem [shape: f32[1,32], index: 15, kind: input, shape index: {}]   ;;  %s3477_s16 = inlined_call_operand.hbm [shape: f32[16,32], index: 16, kind: output, shape index: {}]  }
   0x1   :  { %3488 = sst [smem:[#allocation19_spill]] %s3461_s0 }
   0x2   :  { %3489 = sst [smem:[#allocation20_spill]] %s3462_s1 }
   0x3   :  { %3490 = sst [smem:[#allocation21_spill]] %s3465_s4 }
   0x4   :  { %3491 = sst [smem:[#allocation22_spill]] %s3467_s6 }
   0x5   :  { %3492 = sst [smem:[#allocation23_spill]] %s3471_s10 }
   0x6   :  { %3493 = sst [smem:[#allocation24_spill]] %s3472_s11 }
   0x7   :  { %3494 = sst [smem:[#allocation25_spill]] %s3473_s12 }
   0x8   :  { %3495 = sst [smem:[#allocation26_spill]] %s3474_s13 }
   0x9   :  { %3496 = sst [smem:[#allocation27_spill]] %s3475_s14 }
   0xa   :  { %3497 = sst [smem:[#allocation28_spill]] %s3476_s15 }
   0xb   :  { %3498 = sst [smem:[#allocation29_spill]] %s3477_s16 }
   0xc   :  { %21 = vsyncpa [#allocation5], 0 }
   0xd   :  { %22 = vsyncpa [#allocation8], 0 }
   0xe   :  { %23 = vsyncpa [#allocation6], 0  ;;  %s2953_s21 = smov 0   ;;  %s2955_s22 = smov 0  }
   0xf   :  { %s2957_s23 = smov 0   ;;  %s2959_s24 = smov 0  }
  0x10 LB: > { %3499 = sst [smem:[#allocation15_spill]] %s2835_s22  ;;  %s2972_s25 = sadd.s32 4294967295, %s2843_s24   ;;  %s2843_s24 = sphi %s2959_s24, %s3530_s24   ;;  %s2839_s23 = sphi %s2957_s23, %s3533_s23   ;;  %s2835_s22 = sphi %s2955_s22, %s3532_s22   ;;  %s2831_s21 = sphi %s2953_s21, %s3531_s21  }
  0x11   : > { %3500 = sst [smem:[#allocation16_spill]] %s2839_s23  ;;  %p325_p0 = scmp.ne.s32.totalorder %s2835_s22, %s2831_s21 }
  0x12   : > { %p3480_p1 = scmp.eq.s32.totalorder %s2972_s25, 0  ;;  %p2297_p2 = scmp.ge.s32.totalorder %s2843_s24, 1 }
  0x13   : > { %p451_p3 = scmp.lt.s32.totalorder %s2843_s24, 3  ;;  %s2845_s28 = smov [#allocation4]  }
  0x14   : > { %p2981_p5 = por %p3480_p1, %p325_p0  ;;  %s463_s29 = sshll.u32 %s2845_s28, 4  ;;  %s464_s29 = int_to_ptr.vmem [resolvable:$true] %s463_s29 }
  0x15   : > { %p2985_p6 = pnand %p2297_p2, %p451_p3  ;;  %s2846_s0 = smov [#allocation7]  }
  0x16   : > { %s3501_s26 = scalar_select %p2981_p5, 1, 0 }
  0x17   : > { %s3502_s27 = scalar_select %p2985_p6, 1, 0 }
  0x18   : > { %p2555_p7 = pneg %p2985_p6  ;;  %s477_s17 = sshll.u32 %s2846_s0, 4  ;;  %s2997_s17 = int_to_ptr.vmem [resolvable:$true] %s477_s17 }
  0x19   : > { %s3504_s20 = sld [smem:[#allocation19_spill]] }
  0x1a   : > { %p2993_p8 = pnand %p2555_p7, %p3480_p1 }
  0x1c   : > { %p2687_p10 = pneg %p2993_p8 }
  0x1f   : > { %s2685_s21 = scalar_lea.hbm %s3504_s20, 256 }
  0x20   : > { %p2686_p9 = scmp.ne.s32.totalorder %s3504_s20, %s2685_s21  ;;  %p2692_p13 = scmp.lt.u32.totalorder %s2685_s21, %s3504_s20 }
  0x22   : > { %p2688_p11 = pnand %p2687_p10, %p2686_p9 }
  0x24   : > { %p2689_p12 = pneg %p2688_p11 }
  0x26   : > { %p2694_p0 = pnand %p2692_p13, %p2689_p12 }
  0x28   : > { %2697 = shalt.err (!%p2694_p0)
}
  0x29   : > { %s2698_s0 = scalar_lea.vmem %s464_s29, 256  ;;  %p2706_p4 = scmp.lt.s32.totalorder %s464_s29, %s464_s29 }
  0x2a   : > { %p2699_p2 = scmp.ne.s32.totalorder %s464_s29, %s2698_s0  ;;  %p2707_p1 = scmp.lt.s32.totalorder %s2698_s0, %s2698_s0 }
  0x2c   : > { %p2701_p3 = pnand %p2699_p2, %p2687_p10  ;;  %p2708_p5 = por %p2707_p1, %p2706_p4 }
  0x2e   : > { %p2702_p7 = pneg %p2701_p3 }
  0x30   : > { %p2709_p6 = pnand %p2708_p5, %p2702_p7 }
  0x32   : > { %2712 = shalt.err (!%p2709_p6)
}
  0x33   : > { %s2847_s16 = smov 128   ;;  %s2848_s18 = smov 8  }
  0x34   : > { %2558 = dma.hbm_to_vmem [thread:$0]  (!%p2993_p8), %s3504_s20, 256, %s464_s29, [#allocation5], %s2847_s16, %s2847_s16, %s2848_s18  }
  0x35   : > { %s3505_s1 = sld [smem:[#allocation20_spill]] }
  0x3b   : > { %s2713_s28 = scalar_lea.hbm %s3505_s1, 128 }
  0x3c   : > { %p2714_p9 = scmp.ne.s32.totalorder %s3505_s1, %s2713_s28  ;;  %p2720_p5 = scmp.lt.u32.totalorder %s2713_s28, %s3505_s1 }
  0x3e   : > { %p2716_p1 = pnand %p2714_p9, %p2687_p10 }
  0x40   : > { %p2717_p4 = pneg %p2716_p1 }
  0x42   : > { %p2722_p6 = pnand %p2720_p5, %p2717_p4 }
  0x44   : > { %2725 = shalt.err (!%p2722_p6)
}
  0x45   : > { %s2726_s29 = scalar_lea.vmem %s2997_s17, 128  ;;  %p2734_p0 = scmp.lt.s32.totalorder %s2997_s17, %s2997_s17 }
  0x46   : > { %p2727_p11 = scmp.ne.s32.totalorder %s2997_s17, %s2726_s29  ;;  %p2735_p2 = scmp.lt.s32.totalorder %s2726_s29, %s2726_s29 }
  0x48   : > { %p2729_p12 = pnand %p2727_p11, %p2687_p10  ;;  %p2736_p3 = por %p2735_p2, %p2734_p0 }
  0x4a   : > { %p2730_p13 = pneg %p2729_p12 }
  0x4c   : > { %p2737_p7 = pnand %p2736_p3, %p2730_p13 }
  0x4e   : > { %2740 = shalt.err (!%p2737_p7)
}
  0x4f   : > { %2561 = dma.hbm_to_vmem [thread:$0]  (!%p2993_p8), %s3505_s1, 128, %s2997_s17, [#allocation8]  }
  0x50   : > { %s3047_s13 = sadd.s32 1, %s2843_s24   ;;  %s312_s30 = sadd.s32 1, %s2839_s23 }
  0x51   : > { %3506 = sst [smem:[#allocation17_spill]] %s3047_s13  ;;  %s309_s16 = ssub.s32 %s2843_s24, %s3047_s13 }
  0x52   : > { %p319_p10 = scmp.ne.s32.totalorder %s2839_s23, %s2835_s22  ;;  %p310_p9 = scmp.eq.s32.totalorder %s309_s16, 0 }
  0x53   : > { %p320_p1 = scmp.eq.s32.totalorder %s2843_s24, 0  ;;  %p2568_p4 = scmp.lt.s32.totalorder %s2843_s24, 2 }
  0x54   : > { %s554_s18 = sand.u32 1, %s2843_s24   ;;  %s556_s15 = sand.u32 1, %s2839_s23  }
  0x55   : > { %s3058_s14 = scalar_select %p310_p9, %s2839_s23, %s312_s30  }
  0x56   : > { %p321_p5 = por %p320_p1, %p319_p10  ;;  %s2301_s19 = sshll.u32 %s2843_s24, 4 }
  0x57   : > { %3507 = sst [smem:[#allocation18_spill]] %s3058_s14  ;;  %s3508_s11 = sld [smem:[#allocation24_spill]] }
  0x58   : > { %s557_s17 = scalar_lea.vmem [#allocation9], %s556_s15  ;;  %p3067_p8 = pnand %p2568_p4, %p321_p5 }
  0x59   : > { %s564_s29 = sshll.u32 %s557_s17, 4  ;;  %s555_s24 = scalar_lea.sflag [#allocation5], %s554_s18  ;;  %s3071_s29 = int_to_ptr.vmem [resolvable:$true] %s564_s29 }
  0x5a   : > { %p2743_p11 = pneg %p3067_p8 }
  0x5d   : > { %s3065_s0 = scalar_lea.hbm %s3508_s11, %s2301_s19  ;;  %s2746_s15 = scalar_lea.hbm %s3508_s11, 32 }
  0x5e   : > { %s2741_s12 = scalar_lea.hbm %s3065_s0, 16  ;;  %p2747_p0 = scmp.lt.u32.totalorder %s3065_s0, %s3508_s11 }
  0x5f   : > { %p2742_p6 = scmp.ne.s32.totalorder %s3065_s0, %s2741_s12  ;;  %p2748_p2 = scmp.lt.u32.totalorder %s2746_s15, %s2741_s12 }
  0x60   : > { %p2750_p7 = scmp.lt.u32.totalorder %s2741_s12, %s3065_s0 }
  0x61   : > { %p2744_p12 = pnand %p2743_p11, %p2742_p6  ;;  %p2749_p3 = por %p2748_p2, %p2747_p0 }
  0x63   : > { %p2745_p13 = pneg %p2744_p12  ;;  %p2751_p10 = por %p2750_p7, %p2749_p3 }
  0x65   : > { %p2752_p9 = pnand %p2751_p10, %p2745_p13 }
  0x67   : > { %2755 = shalt.err (!%p2752_p9)
}
  0x68   : > { %s2756_s18 = scalar_lea.vmem %s3071_s29, 16  ;;  %s2849_s28 = smov [#allocation9]  }
  0x69   : > { %p2757_p1 = scmp.ne.s32.totalorder %s3071_s29, %s2756_s18  ;;  %s2761_s17 = sshll.u32 %s2849_s28, 4  ;;  %s2762_s17 = int_to_ptr.vmem [resolvable:$false] %s2761_s17 }
  0x6a   : > { %s2763_s30 = scalar_lea.vmem %s2762_s17, 32  ;;  %p2764_p6 = scmp.lt.s32.totalorder %s3071_s29, %s2762_s17 }
  0x6b   : > { %p2759_p4 = pnand %p2757_p1, %p2743_p11  ;;  %p2765_p12 = scmp.lt.s32.totalorder %s2763_s30, %s2756_s18 }
  0x6d   : > { %p2760_p5 = pneg %p2759_p4  ;;  %p2766_p0 = por %p2765_p12, %p2764_p6 }
  0x6f   : > { %p2767_p2 = pnand %p2766_p0, %p2760_p5 }
  0x71   : > { %2770 = shalt.err (!%p2767_p2)
}
  0x72   : > { %2565 = dma.hbm_to_vmem [thread:$0]  (!%p3067_p8), %s3065_s0, 16, %s3071_s29, %s555_s24  }
  0x73   : > { %p3510_p13 = scmp.ne.s32.totalorder %s3502_s27, 0 }
  0x74   : > { %p3511_p11 = scmp.eq.s32.totalorder (!%p3510_p13), %s2972_s25, 0 }
  0x75   : > { %587 = sbr.rel (%p3510_p13) target bundleno = 4625 (0x1211), region = 84 }
  0x7c   : > { %2814 = dma.done.wait (%p3511_p11), [#allocation5], 256   ;;  %p3512_p3 = pmov %p3511_p11 }
  0x7e   : > { %2816 = vsyncadd (%p3512_p3), [#allocation5], 4294967040  ;;  %p3513_p7 = pmov %p3512_p3 }
  0x7f   : > { %p3514_p10 = pmov %p3512_p3 }
  0x80   : > { %2818 = dma.done.wait (%p3513_p7), [#allocation8], 128  }
  0x81   : > { %2820 = vsyncadd (%p3514_p10), [#allocation8], 4294967168  ;;  %s597_s10 = sand.u32 1, %s2972_s25   ;;  %s599_s0 = sand.u32 1, %s2835_s22  }
  0x82   : > { %s598_s29 = scalar_lea.sflag [#allocation5], %s597_s10  ;;  %s3110_s27 = scalar_lea.vmem [#allocation9], %s599_s0 }
  0x83   : > { %p3515_p8 = scmp.ne.s32.totalorder %s3501_s26, 0 }
  0x85   : > { %2822 = dma.done.wait (%p3515_p8), %s598_s29, 16  }
  0x86   : > { %2824 = vsyncadd (%p3515_p8), %s598_s29, 4294967280  ;;  %p684_p9 = scmp.lt.s32.totalorder %s2972_s25, 1  ;;  %s3516_s4 = sld [smem:[#allocation21_spill]] }
  0x87   : > { %s3517_s6 = sld [smem:[#allocation22_spill]]  ;;  %s3519_s23 = sld [smem:[#allocation26_spill]] }
  0x88   : > { %s3118_s24 = scalar_select %p684_p9, %s2972_s25, 1 }
  0x89   : > { %s3520_s26 = sld [smem:[#allocation25_spill]]  ;;  %p3521_p1 = scmp.ne.s32.totalorder %s2972_s25, 0 }
  0x8a   : > { %s2359_s18 = sshll.u32 %s3118_s24, 4  ;;  %s708_s20 = scalar_lea.vmem %s3469_s8, %s3118_s24  ;;  %v730_v0 = vld [vmem:[#allocation4] sm:$0xff] (!%p3521_p1)  ;;  %v732_v1 = vld [vmem:[#allocation7] sm:$0xff] (!%p3521_p1)  ;;  %vm735_vm0 = vcmask (!%p3521_p1), 261120   ;;  %v731_v2 = vld [vmem:[#allocation4 + $0x8] sm:$0xff] (!%p3521_p1) }
  0x8b   : > { %s711_s30 = scalar_lea.vmem %s3470_s9, %s3118_s24  ;;  %s2362_s12 = sshll.u32 %s3118_s24, 5  ;;  %v733_v3 = vadd.f32 (!%p3521_p1), %v732_v1, %v730_v0  ;;  %v734_v4 = vadd.f32 (!%p3521_p1), %v732_v1, %v731_v2 }
  0x8c   : > { %s3136_s29 = scalar_lea.vmem %s3516_s4, %s2359_s18  ;;  %s3518_s4 = sld [smem:[#allocation23_spill]] }
  0x8d   : > { %s3141_s1 = scalar_lea.vmem %s3517_s6, %s2359_s18  ;;  %s724_s22 = scalar_lea.vmem %s3519_s23, %s3118_s24  ;;  %736 = vst.msk [vmem:[#allocation2] sm:$0xff] (!%p3521_p1), %vm735_vm0, %v733_v3  ;;  %737 = vst.msk [vmem:[#allocation2 + $0x8] sm:$0xff] (!%p3521_p1), %vm735_vm0, %v734_v4 }
  0x8e   : > { %729 = sbr.rel (%p3521_p1) target bundleno = 149 (0x95), region = 100 }
  0x8f   : > { %s3168_s13 = scalar_lea.vmem %s3520_s26, %s2362_s12 }
  0x92   : > { %s3158_s14 = scalar_lea.vmem %s3518_s4, %s2359_s18 }
  0x95 PF: > { %v3172_v5 = vld [vmem:[#allocation2] sm:$0xff]  ;;  %vm742_vm1 = vcmask 261120   ;;  %v3174_v6 = vld [vmem:[#allocation2 + $0x8] sm:$0xff]  ;;  %v2850_v20 = vmov 0.0   ;;  %vm2851_vm2 = vmmov 0   ;;  %s3522_s23 = scalar_lea.vmem %s3463_s2, %s3118_s24  ;;  %s3524_s28 = scalar_lea.vmem %s3466_s5, %s3118_s24  ;;  %vm863_vm3 = vcmask 64512  }
  0x96   : > { %v743_v7 = vsel %vm742_vm1, %v3172_v5, 0.0  ;;  %v746_v8 = vsel %vm742_vm1, %v3174_v6, 0.0  ;;  %v2627_v19 = vld [vmem:[%s3136_s29] sm:$0xff]   ;;  %2409 = vmatprep.subr.bf16.mxu0 %v2850_v20  ;;  %2417 = vmatprep.subr.bf16.mxu1 %v2850_v20  ;;  %v2628_v21 = vld [vmem:[%s3136_s29 + $0x8] sm:$0xff]   ;;  %s3523_s29 = scalar_lea.vmem %s3464_s3, %s3118_s24  ;;  %s2852_s17 = smov 96   ;;  %vm988_vm4 = vcmask 1043456  }
  0x97   : > { %744 = vadd.xlane.f32.xlu0 %v743_v7  ;;  %2410 = vmatpush3.bf16.msra.mxu0 %v2627_v19  ;;  %v2314_v30 = vld [vmem:[%s3522_s23] ss:$0 sm:$0xff]  ;;  %s2853_s10 = smov 64   ;;  %s2854_s0 = smov 88   ;;  %vm1312_vm5 = vcmask 130112   ;;  %vm1543_vm6 = vcmask 195712  }
  0x98   : > { %2413 = vmatprep.mubr.msk.bf16.mxu0 %vm2851_vm2, %v2850_v20  ;;  %2411 = vmatprep.subr.bf16.mxu0 %v2850_v20  ;;  %v2315_v34 = vld [vmem:[%s3523_s29] ss:$0 sm:$0xff]  ;;  %s2855_s12 = smov 120   ;;  %s2856_s16 = smov 56   ;;  %vm1774_vm7 = vcmask 261312   ;;  %vm2011_vm8 = vcmask 523264  }
  0x99   : > { %2419 = vmatprep.mubr.msk.bf16.mxu1 %vm2851_vm2, %v2850_v20  ;;  %v2316_v39 = vld [vmem:[%s3524_s28] ss:$0 sm:$0xff]  ;;  %s2857_s11 = smov 80   ;;  %s2858_s15 = smov 112  }
  0x9a   : > { %s2859_s4 = smov 48   ;;  %s2860_s6 = smov 72  }
  0x9b   : > { %747 = vadd.xlane.f32.xlu0 %v746_v8  ;;  %2412 = vmatpush3.bf16.msra.mxu0 %v2628_v21  ;;  %s2861_s23 = smov 104   ;;  %s2862_s21 = smov 40  }
  0x9c   : > { %2423 = vmatprep.subr.bf16.mxu0 %v2850_v20  ;;  %s2863_s18 = smov 8   ;;  %s2864_s29 = smov 16  }
  0x9d   : > { %s2865_s26 = smov 24   ;;  %s3525_s28 = scalar_lea.vmem %s3468_s7, %s3118_s24 }
  0x9e   : > { %p2352_p4 = scmp.ne.s32.totalorder %s2972_s25, 1 }
 0x124   : > { %v745_v9 = vpop.xlane.xlu0 %744 }
 0x125   : > { %v750_v10 = vmul.f32 0.03125, %v745_v9 }
 0x127   : > { %v752_v11 = vsub.f32 %v3172_v5, %v750_v10 }
 0x128   : > { %v748_v12 = vpop.xlane.xlu0 %747 }
 0x129   : > { %v751_v13 = vmul.f32 0.03125, %v748_v12  ;;  %v754_v14 = vmul.f32 %v752_v11, %v752_v11 }
 0x12b   : > { %v753_v15 = vsub.f32 %v3174_v6, %v751_v13  ;;  %v756_v16 = vsel %vm742_vm1, %v754_v14, 0.0 }
 0x12c   : > { %757 = vadd.xlane.f32.xlu1 %v756_v16 }
 0x12d   : > { %v755_v17 = vmul.f32 %v753_v15, %v753_v15 }
 0x12f   : > { %v759_v18 = vsel %vm742_vm1, %v755_v17, 0.0 }
 0x130   : > { %760 = vadd.xlane.f32.xlu1 %v759_v18 }
 0x1b9   : > { %v758_v22 = vpop.xlane.xlu1 %757 }
 0x1ba   : > { %v762_v23 = vmul.f32 0.03125, %v758_v22 }
 0x1bc   : > { %v764_v24 = vadd.f32 1e-06, %v762_v23 }
 0x1bd   : > { %v761_v25 = vpop.xlane.xlu1 %760 }
 0x1be   : > { %2637 = vrsqrt.f32 %v764_v24  ;;  %v763_v26 = vmul.f32 0.03125, %v761_v25 }
 0x1c0   : > { %v765_v27 = vadd.f32 1e-06, %v763_v26 }
 0x1c2   : > { %2639 = vrsqrt.f32 %v765_v27 }
 0x1c8   : > { %v2638_v28 = vpop.eup %2637 }
 0x1c9   : > { %v768_v29 = vmul.f32 %v2638_v28, %v752_v11 }
 0x1cb   : > { %v776_v33 = vmul.f32 %v2314_v30, %v768_v29 }
 0x1cc   : > { %v2640_v31 = vpop.eup %2639 }
 0x1cd   : > { %v769_v32 = vmul.f32 %v2640_v31, %v753_v15  ;;  %v784_v36 = vadd.f32 %v2315_v34, %v776_v33 }
 0x1cf   : > { %v777_v35 = vmul.f32 %v2314_v30, %v769_v32 }
 0x1d1   : > { %v785_v37 = vadd.f32 %v2315_v34, %v777_v35 }
 0x1d3   : > { %v786_v38 = vpack.c.bf16 %v785_v37, %v784_v36 }
 0x1d5   : > { %2414 = vmatmul.mubr.msk.bf16.vlgmr.msra.gmra.mrb[0].mxu0 %vm742_vm1, %v786_v38 }
 0x1d6   : > { %2425 = vmatprep.mubr.msk.bf16.mxu0 %vm2851_vm2, %v2850_v20 }
 0x2a8   : > { %v847_v40 = vpop.f32.mrb[0].mxu0 }
 0x2a9   : > { %v848_v41 = vadd.f32 %v2316_v39, %v847_v40  ;;  %v2415_v42 = vpop.f32.mrb[1].mxu0 }
 0x2aa   : > { %v850_v43 = vpop.f32.mrb[2].mxu0 }
 0x2ab   : > { %v3212_v44 = vpack.c.bf16 %v848_v41, %v848_v41  ;;  %v851_v45 = vadd.f32 %v2316_v39, %v850_v43  ;;  %v2416_v46 = vpop.f32.mrb[3].mxu0  ;;  %v854_v51 = vmul.f32 0.35355338, %v848_v41 }
 0x2ad   : > { %v3214_v47 = vpack.c.bf16 %v851_v45, %v851_v45  ;;  %861 = vrot.lane.b32.xlu0 %v3212_v44, %s2852_s17  ;;  %v855_v53 = vmul.f32 0.35355338, %v851_v45  ;;  %v3222_v54 = vpack.c.bf16 %v854_v51, %v854_v51 }
 0x2af   : > { %911 = vrot.lane.b32.xlu1 %v3214_v47, %s2852_s17  ;;  %v3224_v55 = vpack.c.bf16 %v855_v53, %v855_v53 }
 0x31f   : > { %v862_v48 = vpop.permute.xlu0 %861 }
 0x320   : > { %v868_v49 = vsel %vm863_vm3, %v862_v48, 0 }
 0x321   : > { %2418 = vmatpush3.bf16.xpose.msra.mxu1 %v868_v49  ;;  %v912_v50 = vpop.permute.xlu1 %911 }
 0x322   : > { %v917_v52 = vsel %vm863_vm3, %v912_v50, 0  ;;  %2429 = vmatprep.subr.bf16.mxu1 %v2850_v20 }
 0x323   : > { %2424 = vmatpush3.bf16.xpose.msra.mxu0 %v917_v52 }
 0x324   : > { %2435 = vmatprep.subr.bf16.mxu0 %v2850_v20 }
 0x328   : > { %2420 = vmatmul.mubr.msk.bf16.vlgmr.msra.gmra.mrb[0].mxu1 %vm863_vm3, %v3222_v54 }
 0x329   : > { %2431 = vmatprep.mubr.msk.bf16.mxu1 %vm2851_vm2, %v2850_v20 }
 0x32a   : > { %2426 = vmatmul.mubr.msk.bf16.vlgmr.msra.gmra.mrb[4].mxu0 %vm863_vm3, %v3224_v55 }
 0x32b   : > { %2437 = vmatprep.mubr.msk.bf16.mxu0 %vm2851_vm2, %v2850_v20 }
 0x3fb   : > { %v904_v56 = vpop.f32.mrb[0].mxu1 }
 0x3fc   : > { %v2421_v57 = vpop.f32.mrb[1].mxu1  ;;  %v959_v58 = vsel %vm863_vm3, %v904_v56, -inf }
 0x3fd   : > { %v907_v59 = vpop.f32.mrb[2].mxu1  ;;  %960 = vmax.xlane.f32.xlu1 %v959_v58  ;;  %v953_v60 = vpop.f32.mrb[4].mxu0 }
 0x3fe   : > { %v2422_v61 = vpop.f32.mrb[3].mxu1  ;;  %v2427_v62 = vpop.f32.mrb[5].mxu0  ;;  %v962_v63 = vsel %vm863_vm3, %v953_v60, -inf }
 0x3ff   : > { %963 = vmax.xlane.f32.xlu0 %v962_v63  ;;  %v956_v0 = vpop.f32.mrb[6].mxu0 }
 0x400   : > { %v2428_v1 = vpop.f32.mrb[7].mxu0 }
 0x40e   : > { %1032 = vrot.lane.b32.xlu1 %v3214_v47, %s2853_s10 }
 0x412   : > { %1085 = vrot.lane.b32.xlu1 %v3212_v44, %s2854_s0 }
 0x48a   : > { %v961_v2 = vpop.xlane.xlu1 %960 }
 0x48b   : > { %v965_v3 = vsub.f32 %v904_v56, %v961_v2 }
 0x48c   : > { %v964_v4 = vpop.xlane.xlu0 %963 }
 0x48d   : > { %v967_v7 = vmul.f32 1.442695, %v965_v3  ;;  %v966_v8 = vsub.f32 %v953_v60, %v964_v4 }
 0x48e   : > { %v1033_v9 = vpop.permute.xlu1 %1032 }
 0x48f   : > { %2641 = vpow2.f32 %v967_v7  ;;  %v969_v10 = vmul.f32 1.442695, %v966_v8  ;;  %v1038_v11 = vsel %vm988_vm4, %v1033_v9, 0 }
 0x490   : > { %2436 = vmatpush3.bf16.msra.mxu0 %v1038_v11 }
 0x491   : > { %2643 = vpow2.f32 %v969_v10  ;;  %2447 = vmatprep.subr.bf16.mxu0 %v2850_v20 }
 0x492   : > { %v1086_v16 = vpop.permute.xlu1 %1085 }
 0x493   : > { %v1091_v28 = vsel %vm863_vm3, %v1086_v16, 0 }
 0x499   : > { %v2642_v12 = vpop.eup %2641 }
 0x49a   : > { %v971_v13 = vsel %vm863_vm3, %v2642_v12, 0.0 }
 0x49b   : > { %v2644_v14 = vpop.eup %2643  ;;  %972 = vadd.xlane.f32.xlu0 %v971_v13 }
 0x49c   : > { %v974_v15 = vsel %vm863_vm3, %v2644_v14, 0.0 }
 0x49d   : > { %975 = vadd.xlane.f32.xlu1 %v974_v15 }
 0x4ae   : > { %1136 = vrot.lane.b32.xlu1 %v3214_v47, %s2854_s0 }
 0x4b1   : > { %983 = vrot.lane.b32.xlu0 %v3212_v44, %s2853_s10 }
 0x4b2   : > { %1134 = vrot.lane.b32.xlu1 %v3224_v55, %s2855_s12 }
 0x4b5   : > { %1083 = vrot.lane.b32.xlu0 %v3222_v54, %s2855_s12 }
 0x528   : > { %v973_v17 = vpop.xlane.xlu0 %972 }
 0x529   : > { %2645 = vrcp.f32 %v973_v17 }
 0x52a   : > { %v976_v18 = vpop.xlane.xlu1 %975 }
 0x52b   : > { %2647 = vrcp.f32 %v976_v18 }
 0x52c   : > { %v984_v19 = vpop.permute.xlu0 %983 }
 0x52d   : > { %v990_v21 = vsel %vm988_vm4, %v984_v19, 0 }
 0x52e   : > { %2430 = vmatpush3.bf16.msra.mxu1 %v990_v21  ;;  %v1137_v27 = vpop.permute.xlu1 %1136 }
 0x52f   : > { %2441 = vmatprep.subr.bf16.mxu1 %v2850_v20  ;;  %v1142_v30 = vsel %vm863_vm3, %v1137_v27, 0 }
 0x530   : > { %v1084_v31 = vpop.permute.xlu0 %1083 }
 0x532   : > { %v1135_v32 = vpop.permute.xlu1 %1134 }
 0x533   : > { %v2646_v22 = vpop.eup %2645 }
 0x534   : > { %v979_v23 = vmul.f32 %v2646_v22, %v2642_v12 }
 0x535   : > { %v2648_v24 = vpop.eup %2647 }
 0x536   : > { %v980_v25 = vmul.f32 %v2648_v24, %v2644_v14  ;;  %v981_v26 = vpack.c.bf16 %v979_v23, %v979_v23 }
 0x538   : > { %2432 = vmatmul.mubr.msk.bf16.vlgmr.msra.gmra.mrb[4].mxu1 %vm863_vm3, %v981_v26  ;;  %v982_v29 = vpack.c.bf16 %v980_v25, %v980_v25 }
 0x539   : > { %2442 = vmatpush3.bf16.xpose.msra.mxu1 %v1091_v28  ;;  %2443 = vmatprep.mubr.msk.bf16.mxu1 %vm2851_vm2, %v2850_v20 }
 0x53a   : > { %2438 = vmatmul.mubr.msk.bf16.vlgmr.msra.gmra.mrb[8].mxu0 %vm863_vm3, %v982_v29  ;;  %2453 = vmatprep.subr.bf16.mxu1 %v2850_v20 }
 0x53b   : > { %2448 = vmatpush3.bf16.xpose.msra.mxu0 %v1142_v30  ;;  %2449 = vmatprep.mubr.msk.bf16.mxu0 %vm2851_vm2, %v2850_v20 }
 0x53c   : > { %2459 = vmatprep.subr.bf16.mxu0 %v2850_v20 }
 0x540   : > { %2444 = vmatmul.mubr.msk.bf16.vlgmr.msra.gmra.mrb[8].mxu1 %vm863_vm3, %v1084_v31 }
 0x541   : > { %2455 = vmatprep.mubr.msk.bf16.mxu1 %vm2851_vm2, %v2850_v20 }
 0x542   : > { %2450 = vmatmul.mubr.msk.bf16.vlgmr.msra.gmra.mrb[12].mxu0 %vm863_vm3, %v1135_v32 }
 0x543   : > { %2461 = vmatprep.mubr.msk.bf16.mxu0 %vm2851_vm2, %v2850_v20 }
 0x60b   : > { %v1026_v33 = vpop.f32.mrb[4].mxu1 }
 0x60c   : > { %1080 = vst.msk [vmem:[#allocation3] sm:$0xff] %vm863_vm3, %v1026_v33  ;;  %v2433_v34 = vpop.f32.mrb[5].mxu1 }
 0x60d   : > { %v1029_v35 = vpop.f32.mrb[6].mxu1  ;;  %v1074_v36 = vpop.f32.mrb[8].mxu0 }
 0x60e   : > { %1081 = vst.msk [vmem:[#allocation3 + $0x8] sm:$0xff] %vm863_vm3, %v1074_v36  ;;  %v2434_v37 = vpop.f32.mrb[7].mxu1  ;;  %v2439_v38 = vpop.f32.mrb[9].mxu0 }
 0x60f   : > { %v1077_v39 = vpop.f32.mrb[10].mxu0 }
 0x610   : > { %v2440_v40 = vpop.f32.mrb[11].mxu0 }
 0x613   : > { %v1127_v41 = vpop.f32.mrb[8].mxu1 }
 0x614   : > { %v2445_v42 = vpop.f32.mrb[9].mxu1  ;;  %v1184_v43 = vsel %vm863_vm3, %v1127_v41, -inf }
 0x615   : > { %1185 = vmax.xlane.f32.xlu0 %v1184_v43  ;;  %v1130_v45 = vpop.f32.mrb[10].mxu1  ;;  %v1178_v46 = vpop.f32.mrb[12].mxu0 }
 0x616   : > { %v2446_v48 = vpop.f32.mrb[11].mxu1  ;;  %v2451_v49 = vpop.f32.mrb[13].mxu0  ;;  %v1187_v50 = vsel %vm863_vm3, %v1178_v46, -inf }
 0x617   : > { %1188 = vmax.xlane.f32.xlu1 %v1187_v50  ;;  %v1181_v51 = vpop.f32.mrb[14].mxu0 }
 0x618   : > { %v2452_v52 = vpop.f32.mrb[15].mxu0 }
 0x628   : > { %1256 = vrot.lane.b32.xlu1 %v3214_v47, %s2856_s16 }
 0x62c   : > { %1317 = vrot.lane.b32.xlu1 %v3212_v44, %s2857_s11 }
 0x630   : > { %1367 = vrot.lane.b32.xlu1 %v3214_v47, %s2857_s11  ;;  %s3528_s11 = sld [smem:[#allocation28_spill]] (!%p2352_p4) }
 0x634   : > { %1365 = vrot.lane.b32.xlu1 %v3224_v55, %s2858_s15 }
 0x6a2   : > { %v1186_v53 = vpop.xlane.xlu0 %1185 }
 0x6a3   : > { %v1190_v56 = vsub.f32 %v1127_v41, %v1186_v53 }
 0x6a4   : > { %v1189_v57 = vpop.xlane.xlu1 %1188 }
 0x6a5   : > { %v1192_v58 = vmul.f32 1.442695, %v1190_v56  ;;  %v1191_v59 = vsub.f32 %v1178_v46, %v1189_v57 }
 0x6a7   : > { %2649 = vpow2.f32 %v1192_v58  ;;  %v1194_v60 = vmul.f32 1.442695, %v1191_v59 }
 0x6a8   : > { %v1257_v61 = vpop.permute.xlu1 %1256 }
 0x6a9   : > { %2651 = vpow2.f32 %v1194_v60  ;;  %v1262_v62 = vsel %vm988_vm4, %v1257_v61, 0 }
 0x6aa   : > { %2460 = vmatpush3.bf16.msra.mxu0 %v1262_v62 }
 0x6ab   : > { %2471 = vmatprep.subr.bf16.mxu0 %v2850_v20 }
 0x6ac   : > { %v1318_v10 = vpop.permute.xlu1 %1317 }
 0x6ad   : > { %v1323_v16 = vsel %vm863_vm3, %v1318_v10, 0 }
 0x6b0   : > { %v1368_v15 = vpop.permute.xlu1 %1367 }
 0x6b1   : > { %v2650_v63 = vpop.eup %2649  ;;  %v1373_v18 = vsel %vm863_vm3, %v1368_v15, 0 }
 0x6b2   : > { %v1196_v0 = vsel %vm863_vm3, %v2650_v63, 0.0 }
 0x6b3   : > { %v2652_v1 = vpop.eup %2651  ;;  %1197 = vadd.xlane.f32.xlu0 %v1196_v0 }
 0x6b4   : > { %v1199_v2 = vsel %vm863_vm3, %v2652_v1, 0.0  ;;  %v1366_v21 = vpop.permute.xlu1 %1365 }
 0x6b7   : > { %1200 = vadd.xlane.f32.xlu0 %v1199_v2 }
 0x6cd   : > { %1208 = vrot.lane.b32.xlu0 %v3212_v44, %s2856_s16 }
 0x6d1   : > { %1315 = vrot.lane.b32.xlu0 %v3222_v54, %s2858_s15 }
 0x740   : > { %v1198_v3 = vpop.xlane.xlu0 %1197 }
 0x741   : > { %2653 = vrcp.f32 %v1198_v3 }
 0x744   : > { %v1201_v4 = vpop.xlane.xlu0 %1200 }
 0x745   : > { %2655 = vrcp.f32 %v1201_v4 }
 0x748   : > { %v1209_v7 = vpop.permute.xlu0 %1208 }
 0x749   : > { %v1214_v8 = vsel %vm988_vm4, %v1209_v7, 0 }
 0x74a   : > { %2454 = vmatpush3.bf16.msra.mxu1 %v1214_v8 }
 0x74b   : > { %v2654_v9 = vpop.eup %2653  ;;  %2465 = vmatprep.subr.bf16.mxu1 %v2850_v20 }
 0x74c   : > { %v1204_v11 = vmul.f32 %v2654_v9, %v2650_v63  ;;  %v1316_v19 = vpop.permute.xlu0 %1315 }
 0x74e   : > { %v1206_v12 = vpack.c.bf16 %v1204_v11, %v1204_v11 }
 0x74f   : > { %v2656_v13 = vpop.eup %2655 }
 0x750   : > { %v1205_v14 = vmul.f32 %v2656_v13, %v2652_v1  ;;  %2456 = vmatmul.mubr.msk.bf16.vlgmr.msra.gmra.mrb[12].mxu1 %vm863_vm3, %v1206_v12 }
 0x751   : > { %2467 = vmatprep.mubr.msk.bf16.mxu1 %vm2851_vm2, %v2850_v20 }
 0x752   : > { %v1207_v17 = vpack.c.bf16 %v1205_v14, %v1205_v14 }
 0x753   : > { %2466 = vmatpush3.bf16.xpose.msra.mxu1 %v1323_v16 }
 0x754   : > { %2462 = vmatmul.mubr.msk.bf16.vlgmr.msra.gmra.mrb[16].mxu0 %vm863_vm3, %v1207_v17  ;;  %2477 = vmatprep.subr.bf16.mxu1 %v2850_v20 }
 0x755   : > { %2472 = vmatpush3.bf16.xpose.msra.mxu0 %v1373_v18  ;;  %2473 = vmatprep.mubr.msk.bf16.mxu0 %vm2851_vm2, %v2850_v20 }
 0x756   : > { %2483 = vmatprep.subr.bf16.mxu0 %v2850_v20 }
 0x75a   : > { %2468 = vmatmul.mubr.msk.bf16.vlgmr.msra.gmra.mrb[16].mxu1 %vm863_vm3, %v1316_v19 }
 0x75b   : > { %2479 = vmatprep.mubr.msk.bf16.mxu1 %vm2851_vm2, %v2850_v20 }
 0x75c   : > { %2474 = vmatmul.mubr.msk.bf16.vlgmr.msra.gmra.mrb[20].mxu0 %vm863_vm3, %v1366_v21 }
 0x75d   : > { %2485 = vmatprep.mubr.msk.bf16.mxu0 %vm2851_vm2, %v2850_v20 }
 0x823   : > { %v3296_v22 = vpop.f32.mrb[12].mxu1 }
 0x824   : > { %v2457_v23 = vpop.f32.mrb[13].mxu1 }
 0x825   : > { %v1253_v24 = vpop.f32.mrb[14].mxu1 }
 0x826   : > { %v2458_v25 = vpop.f32.mrb[15].mxu1 }
 0x827   : > { %v3298_v26 = vpop.f32.mrb[16].mxu0 }
 0x828   : > { %v2463_v27 = vpop.f32.mrb[17].mxu0 }
 0x829   : > { %v1301_v28 = vpop.f32.mrb[18].mxu0 }
 0x82a   : > { %v2464_v29 = vpop.f32.mrb[19].mxu0 }
 0x82d   : > { %v1359_v30 = vpop.f32.mrb[16].mxu1 }
 0x82e   : > { %v2469_v31 = vpop.f32.mrb[17].mxu1  ;;  %v1415_v32 = vsel %vm863_vm3, %v1359_v30, -inf }
 0x82f   : > { %1416 = vmax.xlane.f32.xlu0 %v1415_v32  ;;  %v1362_v33 = vpop.f32.mrb[18].mxu1  ;;  %v1409_v34 = vpop.f32.mrb[20].mxu0 }
 0x830   : > { %v2470_v35 = vpop.f32.mrb[19].mxu1  ;;  %v2475_v36 = vpop.f32.mrb[21].mxu0  ;;  %v1418_v37 = vsel %vm863_vm3, %v1409_v34, -inf }
 0x831   : > { %1419 = vmax.xlane.f32.xlu1 %v1418_v37  ;;  %v1412_v38 = vpop.f32.mrb[22].mxu0 }
 0x832   : > { %v2476_v39 = vpop.f32.mrb[23].mxu0 }
 0x842   : > { %1487 = vrot.lane.b32.xlu1 %v3214_v47, %s2859_s4 }
 0x846   : > { %1548 = vrot.lane.b32.xlu1 %v3212_v44, %s2860_s6 }
 0x84a   : > { %1598 = vrot.lane.b32.xlu1 %v3214_v47, %s2860_s6 }
 0x84e   : > { %1596 = vrot.lane.b32.xlu1 %v3224_v55, %s2861_s23 }
 0x8bc   : > { %v1417_v40 = vpop.xlane.xlu0 %1416 }
 0x8bd   : > { %v1421_v41 = vsub.f32 %v1359_v30, %v1417_v40 }
 0x8be   : > { %v1420_v42 = vpop.xlane.xlu1 %1419 }
 0x8bf   : > { %v1423_v43 = vmul.f32 1.442695, %v1421_v41  ;;  %v1422_v45 = vsub.f32 %v1409_v34, %v1420_v42 }
 0x8c1   : > { %2657 = vpow2.f32 %v1423_v43  ;;  %v1425_v46 = vmul.f32 1.442695, %v1422_v45 }
 0x8c2   : > { %v1488_v48 = vpop.permute.xlu1 %1487 }
 0x8c3   : > { %2659 = vpow2.f32 %v1425_v46  ;;  %v1493_v49 = vsel %vm988_vm4, %v1488_v48, 0 }
 0x8c4   : > { %2484 = vmatpush3.bf16.msra.mxu0 %v1493_v49 }
 0x8c5   : > { %2495 = vmatprep.subr.bf16.mxu0 %v2850_v20 }
 0x8c6   : > { %v1549_v60 = vpop.permute.xlu1 %1548 }
 0x8ca   : > { %v1599_v1 = vpop.permute.xlu1 %1598 }
 0x8cb   : > { %v2658_v50 = vpop.eup %2657  ;;  %v1604_v3 = vsel %vm863_vm3, %v1599_v1, 0 }
 0x8cc   : > { %v1427_v51 = vsel %vm863_vm3, %v2658_v50, 0.0 }
 0x8cd   : > { %v2660_v52 = vpop.eup %2659  ;;  %1428 = vadd.xlane.f32.xlu0 %v1427_v51 }
 0x8ce   : > { %v1430_v55 = vsel %vm863_vm3, %v2660_v52, 0.0  ;;  %v1597_v7 = vpop.permute.xlu1 %1596 }
 0x8d1   : > { %1431 = vadd.xlane.f32.xlu0 %v1430_v55  ;;  %v2629_v55 = vld [vmem:[%s3141_s1] sm:$0xff]  }
 0x8e7   : > { %1439 = vrot.lane.b32.xlu0 %v3212_v44, %s2859_s4 }
 0x8eb   : > { %1546 = vrot.lane.b32.xlu0 %v3222_v54, %s2861_s23  ;;  %v1554_v54 = vsel %vm863_vm3, %v1549_v60, 0 }
 0x95a   : > { %v1429_v53 = vpop.xlane.xlu0 %1428 }
 0x95b   : > { %2661 = vrcp.f32 %v1429_v53  ;;  %v2630_v53 = vld [vmem:[%s3141_s1 + $0x8] sm:$0xff]  }
 0x95e   : > { %v1432_v56 = vpop.xlane.xlu0 %1431 }
 0x95f   : > { %2663 = vrcp.f32 %v1432_v56 }
 0x962   : > { %v1440_v57 = vpop.permute.xlu0 %1439 }
 0x963   : > { %v1445_v58 = vsel %vm988_vm4, %v1440_v57, 0 }
 0x964   : > { %2478 = vmatpush3.bf16.msra.mxu1 %v1445_v58 }
 0x965   : > { %v2662_v59 = vpop.eup %2661  ;;  %2489 = vmatprep.subr.bf16.mxu1 %v2850_v20 }
 0x966   : > { %v1435_v61 = vmul.f32 %v2662_v59, %v2658_v50  ;;  %v1547_v4 = vpop.permute.xlu0 %1546 }
 0x968   : > { %v1437_v62 = vpack.c.bf16 %v1435_v61, %v1435_v61 }
 0x969   : > { %v2664_v63 = vpop.eup %2663 }
 0x96a   : > { %v1436_v0 = vmul.f32 %v2664_v63, %v2660_v52  ;;  %2480 = vmatmul.mubr.msk.bf16.vlgmr.msra.gmra.mrb[20].mxu1 %vm863_vm3, %v1437_v62 }
 0x96b   : > { %2491 = vmatprep.mubr.msk.bf16.mxu1 %vm2851_vm2, %v2850_v20 }
 0x96c   : > { %v1438_v2 = vpack.c.bf16 %v1436_v0, %v1436_v0 }
 0x96d   : > { %2490 = vmatpush3.bf16.xpose.msra.mxu1 %v1554_v54 }
 0x96e   : > { %2486 = vmatmul.mubr.msk.bf16.vlgmr.msra.gmra.mrb[24].mxu0 %vm863_vm3, %v1438_v2  ;;  %2501 = vmatprep.subr.bf16.mxu1 %v2850_v20 }
 0x96f   : > { %2496 = vmatpush3.bf16.xpose.msra.mxu0 %v1604_v3  ;;  %2497 = vmatprep.mubr.msk.bf16.mxu0 %vm2851_vm2, %v2850_v20 }
 0x970   : > { %2507 = vmatprep.subr.bf16.mxu0 %v2850_v20 }
 0x974   : > { %2492 = vmatmul.mubr.msk.bf16.vlgmr.msra.gmra.mrb[24].mxu1 %vm863_vm3, %v1547_v4  ;;  %v2336_v4 = vld [vmem:[%s3525_s28] ss:$0 sm:$0xff] }
 0x975   : > { %2503 = vmatprep.mubr.msk.bf16.mxu1 %vm2851_vm2, %v2850_v20 }
 0x976   : > { %2498 = vmatmul.mubr.msk.bf16.vlgmr.msra.gmra.mrb[28].mxu0 %vm863_vm3, %v1597_v7 }
 0x977   : > { %2509 = vmatprep.mubr.msk.bf16.mxu0 %vm2851_vm2, %v2850_v20 }
 0xa3d   : > { %v1481_v8 = vpop.f32.mrb[20].mxu1 }
 0xa3e   : > { %v2481_v9 = vpop.f32.mrb[21].mxu1 }
 0xa3f   : > { %v1484_v10 = vpop.f32.mrb[22].mxu1 }
 0xa40   : > { %v2482_v11 = vpop.f32.mrb[23].mxu1 }
 0xa41   : > { %v1529_v12 = vpop.f32.mrb[24].mxu0 }
 0xa42   : > { %v2487_v13 = vpop.f32.mrb[25].mxu0 }
 0xa43   : > { %v1532_v14 = vpop.f32.mrb[26].mxu0 }
 0xa44   : > { %v2488_v15 = vpop.f32.mrb[27].mxu0 }
 0xa47   : > { %v1590_v16 = vpop.f32.mrb[24].mxu1 }
 0xa48   : > { %v2493_v17 = vpop.f32.mrb[25].mxu1  ;;  %v1646_v18 = vsel %vm863_vm3, %v1590_v16, -inf }
 0xa49   : > { %1647 = vmax.xlane.f32.xlu0 %v1646_v18  ;;  %v1593_v19 = vpop.f32.mrb[26].mxu1  ;;  %v1640_v21 = vpop.f32.mrb[28].mxu0 }
 0xa4a   : > { %v2494_v23 = vpop.f32.mrb[27].mxu1  ;;  %v2499_v24 = vpop.f32.mrb[29].mxu0  ;;  %v1649_v25 = vsel %vm863_vm3, %v1640_v21, -inf }
 0xa4b   : > { %1650 = vmax.xlane.f32.xlu1 %v1649_v25  ;;  %v1643_v27 = vpop.f32.mrb[30].mxu0 }
 0xa4c   : > { %v2500_v28 = vpop.f32.mrb[31].mxu0 }
 0xa4d   : > { %v2631_v28 = vld [vmem:[%s3158_s14] sm:$0xff]  }
 0xa5c   : > { %1718 = vrot.lane.b32.xlu1 %v3214_v47, %s2862_s21 }
 0xa60   : > { %1306 = vrot.lane.b32.xlu1 %v3296_v22, %s2863_s18 }
 0xa64   : > { %1308 = vrot.lane.b32.xlu1 %v3298_v26, %s2863_s18 }
 0xa68   : > { %1539 = vrot.lane.b32.xlu1 %v1529_v12, %s2864_s29 }
 0xad6   : > { %v1648_v29 = vpop.xlane.xlu0 %1647 }
 0xad7   : > { %v1652_v30 = vsub.f32 %v1590_v16, %v1648_v29  ;;  %v2632_v29 = vld [vmem:[%s3158_s14 + $0x8] sm:$0xff]  }
 0xad8   : > { %v1651_v31 = vpop.xlane.xlu1 %1650 }
 0xad9   : > { %v1654_v32 = vmul.f32 1.442695, %v1652_v30  ;;  %v1653_v33 = vsub.f32 %v1640_v21, %v1651_v31 }
 0xadb   : > { %2665 = vpow2.f32 %v1654_v32  ;;  %v1656_v34 = vmul.f32 1.442695, %v1653_v33 }
 0xadc   : > { %v1719_v35 = vpop.permute.xlu1 %1718 }
 0xadd   : > { %2667 = vpow2.f32 %v1656_v34  ;;  %v1724_v47 = vsel %vm988_vm4, %v1719_v35, 0 }
 0xade   : > { %2508 = vmatpush3.bf16.msra.mxu0 %v1724_v47 }
 0xadf   : > { %2521 = vmatprep.subr.bf16.mxu0 %v2850_v20 }
 0xae0   : > { %v1307_v22 = vpop.permute.xlu1 %1306 }
 0xae1   : > { %1313 = vst.msk [vmem:[#allocation3] sm:$0xff] %vm1312_vm5, %v1307_v22 }
 0xae4   : > { %v1309_v26 = vpop.permute.xlu1 %1308 }
 0xae5   : > { %v2666_v36 = vpop.eup %2665  ;;  %1314 = vst.msk [vmem:[#allocation3 + $0x8] sm:$0xff] %vm1312_vm5, %v1309_v26  ;;  %v2340_v26 = vld [vmem:[%s708_s20] ss:$0 sm:$0xff] }
 0xae6   : > { %v1658_v37 = vsel %vm863_vm3, %v2666_v36, 0.0 }
 0xae7   : > { %v2668_v38 = vpop.eup %2667  ;;  %1659 = vadd.xlane.f32.xlu0 %v1658_v37 }
 0xae8   : > { %v1540_v39 = vpop.permute.xlu1 %1539  ;;  %v1661_v40 = vsel %vm863_vm3, %v2668_v38, 0.0 }
 0xae9   : > { %1545 = vst.msk [vmem:[#allocation3 + $0x8] sm:$0xff] %vm1543_vm6, %v1540_v39  ;;  %v2341_v39 = vld [vmem:[%s711_s30] ss:$0 sm:$0xff]  ;;  %s3527_s30 = sld [smem:[#allocation27_spill]] (!%p2352_p4) }
 0xaeb   : > { %1662 = vadd.xlane.f32.xlu0 %v1661_v40 }
 0xb01   : > { %1670 = vrot.lane.b32.xlu0 %v3212_v44, %s2862_s21 }
 0xb05   : > { %1537 = vrot.lane.b32.xlu0 %v1481_v8, %s2864_s29 }
 0xb74   : > { %v1660_v41 = vpop.xlane.xlu0 %1659 }
 0xb75   : > { %2669 = vrcp.f32 %v1660_v41 }
 0xb78   : > { %v1663_v42 = vpop.xlane.xlu0 %1662 }
 0xb79   : > { %2671 = vrcp.f32 %v1663_v42 }
 0xb7c   : > { %v1671_v43 = vpop.permute.xlu0 %1670 }
 0xb7d   : > { %v1676_v45 = vsel %vm988_vm4, %v1671_v43, 0 }
 0xb7e   : > { %2502 = vmatpush3.bf16.msra.mxu1 %v1676_v45  ;;  %v2633_v45 = vld [vmem:[%s3168_s13] sm:$0xff]  }
 0xb7f   : > { %v2670_v46 = vpop.eup %2669  ;;  %2513 = vmatprep.subr.bf16.mxu1 %v2850_v20 }
 0xb80   : > { %v1666_v48 = vmul.f32 %v2670_v46, %v2666_v36  ;;  %v1538_v49 = vpop.permute.xlu0 %1537  ;;  %v2634_v46 = vld [vmem:[%s3168_s13 + $0x8] sm:$0xff]  }
 0xb81   : > { %1544 = vst.msk [vmem:[#allocation3] sm:$0xff] %vm1543_vm6, %v1538_v49  ;;  %v2636_v49 = vld [vmem:[%s3168_s13 + $0x18] sm:$0xff]  }
 0xb82   : > { %v1668_v50 = vpack.c.bf16 %v1666_v48, %v1666_v48  ;;  %v2635_v48 = vld [vmem:[%s3168_s13 + $0x10] sm:$0xff]  }
 0xb83   : > { %v2672_v44 = vpop.eup %2671 }
 0xb84   : > { %v1667_v51 = vmul.f32 %v2672_v44, %v2668_v38  ;;  %2504 = vmatmul.mubr.msk.bf16.vlgmr.msra.gmra.mrb[28].mxu1 %vm863_vm3, %v1668_v50  ;;  %v2342_v50 = vld [vmem:[%s3110_s27] ss:$0 sm:$0xff] }
 0xb85   : > { %2517 = vmatprep.mubr.msk.bf16.mxu1 %vm2851_vm2, %v2850_v20  ;;  %2514 = vmatpush3.bf16.msra.mxu1 %v2629_v55 }
 0xb86   : > { %v1669_v52 = vpack.c.bf16 %v1667_v51, %v1667_v51  ;;  %2515 = vmatprep.subr.bf16.mxu1 %v2850_v20 }
 0xb88   : > { %2510 = vmatmul.mubr.msk.bf16.vlgmr.msra.gmra.mrb[32].mxu0 %vm863_vm3, %v1669_v52 }
 0xb89   : > { %2525 = vmatprep.mubr.msk.bf16.mxu0 %vm2851_vm2, %v2850_v20  ;;  %2516 = vmatpush3.bf16.msra.mxu1 %v2630_v53 }
 0xb8a   : > { %2529 = vmatprep.subr.bf16.mxu1 %v2850_v20  ;;  %2522 = vmatpush3.bf16.msra.mxu0 %v2631_v28 }
 0xb8b   : > { %2523 = vmatprep.subr.bf16.mxu0 %v2850_v20 }
 0xb8e   : > { %2524 = vmatpush3.bf16.msra.mxu0 %v2632_v29 }
 0xc57   : > { %v1712_v56 = vpop.f32.mrb[28].mxu1 }
 0xc58   : > { %1768 = vrot.lane.b32.xlu0 %v1712_v56, %s2865_s26  ;;  %v2505_v57 = vpop.f32.mrb[29].mxu1 }
 0xc59   : > { %v1715_v58 = vpop.f32.mrb[30].mxu1 }
 0xc5a   : > { %v2506_v59 = vpop.f32.mrb[31].mxu1 }
 0xc5b   : > { %v1760_v60 = vpop.f32.mrb[32].mxu0 }
 0xc5c   : > { %1770 = vrot.lane.b32.xlu1 %v1760_v60, %s2865_s26  ;;  %v2511_v61 = vpop.f32.mrb[33].mxu0 }
 0xc5d   : > { %v1763_v62 = vpop.f32.mrb[34].mxu0 }
 0xc5e   : > { %v2512_v63 = vpop.f32.mrb[35].mxu0 }
 0xcca   : > { %v1769_v0 = vpop.permute.xlu0 %1768 }
 0xccb   : > { %1775 = vst.msk [vmem:[#allocation3] sm:$0xff] %vm1774_vm7, %v1769_v0 }
 0xcce   : > { %v1771_v1 = vpop.permute.xlu1 %1770 }
 0xccf   : > { %1776 = vst.msk [vmem:[#allocation3 + $0x8] sm:$0xff] %vm1774_vm7, %v1771_v1 }
 0xcd2   : > { %v1777_v54 = vld [vmem:[#allocation3] sm:$0xff] }
 0xcd6   : > { %v1778_v2 = vld [vmem:[#allocation3 + $0x8] sm:$0xff] }
 0xcd7   : > { %v1779_v3 = vpack.c.bf16 %v1778_v2, %v1777_v54  ;;  %v2346_v2 = vld [vmem:[%s724_s22] ss:$0 sm:$0xff] }
 0xcd9   : > { %2518 = vmatmul.mubr.msk.bf16.vlgmr.msra.gmra.mrb[32].mxu1 %vm742_vm1, %v1779_v3 }
 0xcda   : > { %2537 = vmatprep.mubr.msk.bf16.mxu1 %vm2851_vm2, %v2850_v20  ;;  %2530 = vmatpush3.bf16.msra.mxu1 %v2633_v45 }
 0xcdb   : > { %2531 = vmatprep.subr.bf16.mxu1 %v2850_v20 }
 0xcde   : > { %2532 = vmatpush3.bf16.msra.mxu1 %v2634_v46 }
 0xcdf   : > { %2533 = vmatprep.subr.bf16.mxu1 %v2850_v20 }
 0xce2   : > { %2534 = vmatpush3.bf16.msra.mxu1 %v2635_v48 }
 0xce3   : > { %2535 = vmatprep.subr.bf16.mxu1 %v2850_v20 }
 0xce6   : > { %2536 = vmatpush3.bf16.msra.mxu1 %v2636_v49 }
 0xdac   : > { %v1840_v7 = vpop.f32.mrb[32].mxu1 }
 0xdad   : > { %v1841_v8 = vadd.f32 %v2336_v4, %v1840_v7  ;;  %v2519_v9 = vpop.f32.mrb[33].mxu1 }
 0xdae   : > { %v1843_v10 = vpop.f32.mrb[34].mxu1 }
 0xdaf   : > { %v3367_v11 = vadd.f32 %v1841_v8, %v3172_v5  ;;  %v1844_v12 = vadd.f32 %v2336_v4, %v1843_v10  ;;  %v2520_v13 = vpop.f32.mrb[35].mxu1 }
 0xdb1   : > { %v3370_v14 = vadd.f32 %v1844_v12, %v3174_v6  ;;  %v1851_v15 = vsel %vm742_vm1, %v3367_v11, 0.0 }
 0xdb2   : > { %1852 = vadd.xlane.f32.xlu0 %v1851_v15 }
 0xdb3   : > { %v1854_v16 = vsel %vm742_vm1, %v3370_v14, 0.0 }
 0xdb4   : > { %1855 = vadd.xlane.f32.xlu1 %v1854_v16 }
 0xe3f   : > { %v1853_v17 = vpop.xlane.xlu0 %1852 }
 0xe40   : > { %v1857_v18 = vmul.f32 0.03125, %v1853_v17 }
 0xe41   : > { %v1856_v19 = vpop.xlane.xlu1 %1855 }
 0xe42   : > { %v1859_v5 = vsub.f32 %v3367_v11, %v1857_v18  ;;  %v1858_v21 = vmul.f32 0.03125, %v1856_v19 }
 0xe44   : > { %v1860_v23 = vsub.f32 %v3370_v14, %v1858_v21  ;;  %v1861_v6 = vmul.f32 %v1859_v5, %v1859_v5 }
 0xe46   : > { %v1863_v24 = vsel %vm742_vm1, %v1861_v6, 0.0  ;;  %v1862_v25 = vmul.f32 %v1860_v23, %v1860_v23 }
 0xe47   : > { %1864 = vadd.xlane.f32.xlu0 %v1863_v24 }
 0xe48   : > { %v1866_v27 = vsel %vm742_vm1, %v1862_v25, 0.0 }
 0xe4b   : > { %1867 = vadd.xlane.f32.xlu0 %v1866_v27 }
 0xed4   : > { %v1865_v30 = vpop.xlane.xlu0 %1864 }
 0xed5   : > { %v1869_v31 = vmul.f32 0.03125, %v1865_v30 }
 0xed7   : > { %v1871_v32 = vadd.f32 1e-06, %v1869_v31 }
 0xed8   : > { %v1868_v33 = vpop.xlane.xlu0 %1867 }
 0xed9   : > { %2673 = vrsqrt.f32 %v1871_v32  ;;  %v1870_v34 = vmul.f32 0.03125, %v1868_v33  ;;  %v2353_v33 = vld [vmem:[%s3527_s30] ss:$0 sm:$0xff] (!%p2352_p4) }
 0xedb   : > { %v1872_v35 = vadd.f32 1e-06, %v1870_v34 }
 0xedd   : > { %2675 = vrsqrt.f32 %v1872_v35  ;;  %v2354_v35 = vld [vmem:[%s3528_s11] ss:$0 sm:$0xff] (!%p2352_p4) }
 0xee3   : > { %v2674_v47 = vpop.eup %2673 }
 0xee4   : > { %v1875_v22 = vmul.f32 %v2674_v47, %v1859_v5 }
 0xee6   : > { %v1883_v37 = vmul.f32 %v2340_v26, %v1875_v22 }
 0xee7   : > { %v2676_v36 = vpop.eup %2675 }
 0xee8   : > { %v1876_v38 = vmul.f32 %v2676_v36, %v1860_v23  ;;  %v1891_v41 = vadd.f32 %v2341_v39, %v1883_v37 }
 0xeea   : > { %v1884_v40 = vmul.f32 %v2340_v26, %v1876_v38 }
 0xeec   : > { %v1892_v42 = vadd.f32 %v2341_v39, %v1884_v40 }
 0xeee   : > { %v1893_v43 = vpack.c.bf16 %v1892_v42, %v1891_v41 }
 0xef0   : > { %2526 = vmatmul.mubr.msk.bf16.vlgmr.msra.gmra.mrb[36].mxu0 %vm742_vm1, %v1893_v43 }
 0xfc3   : > { %v1954_v44 = vpop.f32.mrb[36].mxu0 }
 0xfc4   : > { %v1955_v51 = vadd.f32 %v2342_v50, %v1954_v44  ;;  %v2527_v52 = vpop.f32.mrb[37].mxu0 }
 0xfc5   : > { %v1957_v55 = vpop.f32.mrb[38].mxu0 }
 0xfc6   : > { %v1963_v53 = vmul.f32 0.70710677, %v1955_v51  ;;  %v1958_v56 = vadd.f32 %v2342_v50, %v1957_v55  ;;  %v2528_v57 = vpop.f32.mrb[39].mxu0  ;;  %v1961_v62 = vmul.f32 0.5, %v1955_v51 }
 0xfc8   : > { %2677 = verf.f32 %v1963_v53  ;;  %v1964_v58 = vmul.f32 0.70710677, %v1958_v56  ;;  %v1962_v63 = vmul.f32 0.5, %v1958_v56 }
 0xfca   : > { %2679 = verf.f32 %v1964_v58 }
 0xfd2   : > { %v2678_v59 = vpop.eup %2677 }
 0xfd3   : > { %v1967_v60 = vadd.f32 1.0, %v2678_v59 }
 0xfd4   : > { %v2680_v61 = vpop.eup %2679 }
 0xfd5   : > { %v1968_v20 = vadd.f32 1.0, %v2680_v61  ;;  %v1969_v0 = vmul.f32 %v1967_v60, %v1961_v62 }
 0xfd7   : > { %v1970_v1 = vmul.f32 %v1968_v20, %v1962_v63 }
 0xfd9   : > { %v1971_v54 = vpack.c.bf16 %v1970_v1, %v1969_v0 }
 0xfdb   : > { %2538 = vmatmul.mubr.msk.bf16.vlgmr.msra.gmra.mrb[36].mxu1 %vm2011_vm8, %v1971_v54 }
0x10ae   : > { %v2049_v3 = vpop.f32.mrb[36].mxu1 }
0x10af   : > { %v2050_v4 = vadd.f32 %v2346_v2, %v2049_v3  ;;  %v2539_v7 = vpop.f32.mrb[37].mxu1  ;;  %2063 = sbr.rel (%p2352_p4) target bundleno = 4593 (0x11f1), region = 104 }
0x10b0   : > { %v2052_v8 = vpop.f32.mrb[38].mxu1 }
0x10b1   : > { %v2056_v9 = vadd.f32 %v2050_v4, %v3367_v11  ;;  %v2053_v10 = vadd.f32 %v2346_v2, %v2052_v8  ;;  %v2540_v12 = vpop.f32.mrb[39].mxu1 }
0x10b3   : > { %2058 = vst.msk [vmem:[#allocation2] sm:$0xff] %vm742_vm1, %v2056_v9  ;;  %v2057_v13 = vadd.f32 %v2053_v10, %v3370_v14  ;;  %v2066_v15 = vsel (!%p2352_p4), %vm742_vm1, %v2056_v9, 0.0 }
0x10b4   : > { %2067 = vadd.xlane.f32.xlu0 (!%p2352_p4), %v2066_v15 }
0x10b5   : > { %2059 = vst.msk [vmem:[#allocation2 + $0x8] sm:$0xff] %vm742_vm1, %v2057_v13  ;;  %v2069_v16 = vsel (!%p2352_p4), %vm742_vm1, %v2057_v13, 0.0 }
0x10b8   : > { %2070 = vadd.xlane.f32.xlu0 %v2069_v16 }
0x1141   : > { %v2068_v17 = vpop.xlane.xlu0 %2067 }
0x1142   : > { %v2072_v18 = vmul.f32 0.03125, %v2068_v17 }
0x1144   : > { %v2074_v11 = vsub.f32 %v2056_v9, %v2072_v18 }
0x1145   : > { %v2071_v19 = vpop.xlane.xlu0 %2070 }
0x1146   : > { %v2073_v5 = vmul.f32 0.03125, %v2071_v19  ;;  %v2076_v21 = vmul.f32 %v2074_v11, %v2074_v11 }
0x1148   : > { %v2075_v23 = vsub.f32 %v2057_v13, %v2073_v5  ;;  %v2078_v14 = vsel %vm742_vm1, %v2076_v21, 0.0 }
0x1149   : > { %2079 = vadd.xlane.f32.xlu1 %v2078_v14 }
0x114a   : > { %v2077_v6 = vmul.f32 %v2075_v23, %v2075_v23 }
0x114c   : > { %v2081_v24 = vsel %vm742_vm1, %v2077_v6, 0.0 }
0x114d   : > { %2082 = vadd.xlane.f32.xlu1 %v2081_v24 }
0x11d6   : > { %v2080_v25 = vpop.xlane.xlu1 %2079 }
0x11d7   : > { %v2084_v27 = vmul.f32 0.03125, %v2080_v25 }
0x11d9   : > { %v2086_v28 = vadd.f32 1e-06, %v2084_v27 }
0x11da   : > { %v2083_v29 = vpop.xlane.xlu1 %2082 }
0x11db   : > { %2681 = vrsqrt.f32 %v2086_v28  ;;  %v2085_v30 = vmul.f32 0.03125, %v2083_v29 }
0x11dd   : > { %v2087_v31 = vadd.f32 1e-06, %v2085_v30 }
0x11df   : > { %2683 = vrsqrt.f32 %v2087_v31 }
0x11e5   : > { %v2682_v32 = vpop.eup %2681 }
0x11e6   : > { %v2090_v34 = vmul.f32 %v2682_v32, %v2074_v11 }
0x11e8   : > { %v2098_v47 = vmul.f32 %v2353_v33, %v2090_v34 }
0x11e9   : > { %v2684_v22 = vpop.eup %2683 }
0x11ea   : > { %v2106_v26 = vadd.f32 %v2354_v35, %v2098_v47  ;;  %v2091_v36 = vmul.f32 %v2684_v22, %v2075_v23 }
0x11ec   : > { %2108 = vst.msk [vmem:[#allocation10] sm:$0xff] %vm742_vm1, %v2106_v26  ;;  %v2099_v37 = vmul.f32 %v2353_v33, %v2091_v36 }
0x11ee   : > { %v2107_v38 = vadd.f32 %v2354_v35, %v2099_v37 }
0x11f0   : > { %2109 = vst.msk [vmem:[#allocation10 + $0x8] sm:$0xff] %vm742_vm1, %v2107_v38 }
0x11f1 PF: > { %p2571_p5 = scmp.eq.s32.totalorder %s2972_s25, 1  ;;  %s2866_s15 = smov [#allocation10]  }
0x11f2   : > { %s2116_s4 = sshll.u32 %s2866_s15, 4  ;;  %s2117_s4 = int_to_ptr.vmem [resolvable:$true] %s2116_s4 }
0x11f3   : > { %s2771_s6 = scalar_lea.vmem %s2117_s4, 256  ;;  %p2778_p2 = scmp.lt.s32.totalorder %s2117_s4, %s2117_s4 }
0x11f4   : > { %p2772_p6 = scmp.ne.s32.totalorder %s2117_s4, %s2771_s6  ;;  %p2779_p13 = scmp.lt.s32.totalorder %s2771_s6, %s2771_s6 }
0x11f6   : > { %p2773_p12 = pnand %p2772_p6, %p2571_p5  ;;  %p2780_p11 = por %p2779_p13, %p2778_p2 }
0x11f8   : > { %p2774_p0 = pneg %p2773_p12 }
0x11fa   : > { %p2781_p3 = pnand %p2780_p11, %p2774_p0 }
0x11fc   : > { %2784 = shalt.err (!%p2781_p3)
}
0x11fd   : > { %s3529_s29 = sld [smem:[#allocation29_spill]] }
0x1203   : > { %s2785_s26 = scalar_lea.hbm %s3529_s29, 256 }
0x1204   : > { %p2786_p7 = scmp.ne.s32.totalorder %s3529_s29, %s2785_s26  ;;  %p2791_p9 = scmp.lt.u32.totalorder %s2785_s26, %s3529_s29 }
0x1206   : > { %p2787_p10 = pnand %p2786_p7, %p2571_p5 }
0x1208   : > { %p2788_p8 = pneg %p2787_p10 }
0x120a   : > { %p2793_p1 = pnand %p2791_p9, %p2788_p8 }
0x120c   : > { %2796 = shalt.err (!%p2793_p1)
}
0x120d   : > { %s2867_s10 = smov 128  }
0x120e   : > { %2552 = dma.vmem_to_hbm [thread:$0]  (%p2571_p5), %s2117_s4, 256, %s3529_s29, [#allocation6], %s2867_s10, %s2867_s10, %s2863_s18  }
0x120f   : > { %2826 = dma.done.wait (%p2571_p5), [#allocation6], 256  }
0x1210   : > { %2828 = vsyncadd (%p2571_p5), [#allocation6], 4294967040 }
0x1211 PF: > { %s3530_s24 = sld [smem:[#allocation17_spill]]  ;;  %s3531_s21 = sld [smem:[#allocation15_spill]] }
0x1212   : > { %s3532_s22 = sld [smem:[#allocation16_spill]]  ;;  %s3533_s23 = sld [smem:[#allocation18_spill]] }
0x1217   : > { %p26_p4 = scmp.ge.s32.totalorder %s3530_s24, 4  }
0x1219   :  { %28 = sbr.rel (!%p26_p4) target bundleno = 16 (0x10), region = 169 }
0x1220   :  { %2132 = vsyncpa [#allocation5], 1 }
0x1221   :  { %2134 = vsyncpa [#allocation5 + $0x1], 1 }
0x1222   :  { %2135 = vsyncpa [#allocation8], 1 }
0x1223   :  { %2136 = vsyncpa [#allocation6], 1 }
0x1224   :  { %2138 = vsyncpa [#allocation6 + $0x1], 1 }

</bundles_post_ra>
